<compile_context>
chip_gen: v6e
topology: v6e:2x2x1
jax: 0.10.0
libtpu: 0.0.40
codegen_flags: <defaults>
</compile_context>

<pallas_src>
import functools

import jax
import jax.numpy as jnp
from jax.experimental import pallas as pl
from jax.experimental.pallas import tpu as pltpu


def _round_up(x, m):
    return (x + m - 1) // m * m


def _pick_m_tile(M, max_tile=4096):
    """Lane-tile size: big enough to amortize per-step overhead, small enough
    that the 'parallel' grid keeps >= 2 steps (v7x has 2 TensorCores)."""
    if M <= 128:
        return M                       # single full-extent block
    if M <= 256:
        return 128                     # two lane-dense steps
    return max(128, min(max_tile, _round_up(pl.cdiv(M, 2), 128)))


# ---------------------------------------------------------------------------
# Pallas kernels
# ---------------------------------------------------------------------------
def _convmm_kernel(act, w_ref, b_ref, x_ref, o_ref):
    """o = act(w @ x + b), transposed layout: M (=B*OH*OW) on the lane axis."""
    y = jnp.dot(w_ref[...], x_ref[...], preferred_element_type=jnp.float32)
    y = y + b_ref[...]                       # (OC, 1) broadcast along lanes
    if act == "tanh":
        y = jnp.tanh(y)
    elif act == "relu":
        y = jnp.maximum(y, 0.0)
    o_ref[...] = y.astype(o_ref.dtype)


def matmul_t_bias_act(w, b_col, x, act="none", out_dtype=jnp.bfloat16):
    """act(w @ x + b) with the M axis tiled on lanes; ragged last block masked.

    w: (OC, K) bf16, b_col: (OC, 1) f32, x: (K, M) bf16 -> (OC, M) out_dtype.
    """
    OC, K = w.shape
    M = x.shape[1]
    if x.dtype != jnp.bfloat16:          # no-op in the normal (pre-cast) path
        x = x.astype(jnp.bfloat16)
    m_tile = _pick_m_tile(M)
    return pl.pallas_call(
        functools.partial(_convmm_kernel, act),
        out_shape=jax.ShapeDtypeStruct((OC, M), out_dtype),
        grid=(pl.cdiv(M, m_tile),),
        in_specs=[
            pl.BlockSpec((OC, K), lambda i: (0, 0)),      # whole weight, resident
            pl.BlockSpec((OC, 1), lambda i: (0, 0)),      # bias column
            pl.BlockSpec((K, m_tile), lambda i: (0, i)),  # lane-dense input tile
        ],
        out_specs=pl.BlockSpec((OC, m_tile), lambda i: (0, i)),  # lane-dense store
        compiler_params=pltpu.CompilerParams(
            dimension_semantics=("parallel",)),
    )(w, b_col, x)


def _tail_kernel(w3_ref, b3_ref, w4_ref, b4_ref, w5_ref, b5_ref, x_ref, o_ref):
    """conv3(as matmul) -> flatten -> fc1 -> ReLU -> fc2, fully in VMEM."""
    f32 = jnp.float32
    h = jnp.dot(w3_ref[...], x_ref[...], preferred_element_type=f32) + b3_ref[...]
    # conv3 has no activation in the reference model (Flatten follows directly).
    # Shrink the live (120, b_tile) intermediate immediately -> less vreg spill.
    h = h.astype(jnp.bfloat16)
    h = jnp.dot(w4_ref[...], h, preferred_element_type=f32) + b4_ref[...]
    h = jnp.maximum(h, 0.0).astype(jnp.bfloat16)          # ReLU, bf16 for fc2
    y = jnp.dot(w5_ref[...], h, preferred_element_type=f32) + b5_ref[...]
    o_ref[...] = y.astype(o_ref.dtype)


def tail_fused(w3, b3, w4, b4, w5, b5, x):
    """Fused network tail. x: (K3, B) channel-major features -> (n_out, B) f32."""
    OC3, K3 = w3.shape
    H4 = w4.shape[0]
    NOUT = w5.shape[0]
    B = x.shape[1]
    # Keep b_tile at 256 (bigger tiles spill the (120, b) intermediate heavily);
    # ragged last block is masked by Pallas — no padding, no output slice.
    b_tile = B if B <= 256 else 256
    return pl.pallas_call(
        _tail_kernel,
        out_shape=jax.ShapeDtypeStruct((NOUT, B), jnp.float32),
        grid=(pl.cdiv(B, b_tile),),
        in_specs=[
            pl.BlockSpec((OC3, K3), lambda i: (0, 0)),
            pl.BlockSpec((OC3, 1), lambda i: (0, 0)),
            pl.BlockSpec((H4, OC3), lambda i: (0, 0)),
            pl.BlockSpec((H4, 1), lambda i: (0, 0)),
            pl.BlockSpec((NOUT, H4), lambda i: (0, 0)),
            pl.BlockSpec((NOUT, 1), lambda i: (0, 0)),
            pl.BlockSpec((K3, b_tile), lambda i: (0, i)),
        ],
        out_specs=pl.BlockSpec((NOUT, b_tile), lambda i: (0, i)),
        compiler_params=pltpu.CompilerParams(
            dimension_semantics=("parallel",)),
    )(w3, b3, w4, b4, w5, b5, x)


# ---------------------------------------------------------------------------
# Channel-major glue (thin XLA data movement around the kernels)
# ---------------------------------------------------------------------------
def _im2col_cm(xc, k):
    """xc: (C, B, H, W) -> cols (C*k*k, B*OH*OW), OH, OW (dtype preserved).

    K ordering is (c, kh, kw), matching the flatten of a PyTorch conv weight
    (OC, C, k, k) -> (OC, C*k*k). The large M axis lands on the lane dimension
    inside the Pallas kernels.
    """
    # TODO(synk): move this 25-tap patch gather into the conv kernel (VMEM-resident
    # block, per-tap dot accumulation) to kill the ~25x im2col HBM expansion at
    # production batch sizes; budget v7x's 64 MiB VMEM when doing so.
    C, B, H, W = xc.shape
    OH, OW = H - k + 1, W - k + 1
    taps = [xc[:, :, kh:kh + OH, kw:kw + OW]
            for kh in range(k) for kw in range(k)]       # k*k x (C, B, OH, OW)
    cols = jnp.stack(taps, axis=1)                       # (C, k*k, B, OH, OW)
    return cols.reshape(C * k * k, B * OH * OW), OH, OW


def conv2d_cm(xc, w_mat, b_col, k, act="none"):
    """Conv2d (stride 1, valid) + bias + activation on channel-major bf16 input.

    xc: (C, B, H, W) bf16; w_mat: (OC, C*k*k) bf16; b_col: (OC, 1) f32
    -> (OC, B, OH, OW) bf16.
    """
    OC = w_mat.shape[0]
    B = xc.shape[1]
    cols, OH, OW = _im2col_cm(xc, k)                     # (C*k*k, B*OH*OW) bf16
    y = matmul_t_bias_act(w_mat, b_col, cols, act=act)   # (OC, M) bf16
    return y.reshape(OC, B, OH, OW)


def avgpool2x2_cm(xc):
    """AvgPool2d(2,2) on (C, B, H, W). Trivial 4:1 reduction -> left to XLA."""
    # TODO(synk): fuse this 2x2 pool into the conv epilogue (lane-axis roll/selects)
    # or pool the VMEM-resident block once im2col moves in-kernel.
    C, B, H, W = xc.shape
    return xc.reshape(C, B, H // 2, 2, W // 2, 2).mean(axis=(3, 5))


# ---------------------------------------------------------------------------
# LeNet parameters + forward
# ---------------------------------------------------------------------------
def init_lenet_params(key, in_ch, n_out):
    ks = jax.random.split(key, 10)

    def u(k, shape, fan_in):
        bound = 1.0 / jnp.sqrt(fan_in)
        return jax.random.uniform(k, shape, jnp.float32, -bound, bound)

    return {
        "w1": u(ks[0], (6, in_ch, 5, 5), in_ch * 25),
        "b1": u(ks[1], (6,), in_ch * 25),
        "w2": u(ks[2], (16, 6, 5, 5), 6 * 25),
        "b2": u(ks[3], (16,), 6 * 25),
        "w3": u(ks[4], (120, 16, 5, 5), 16 * 25),
        "b3": u(ks[5], (120,), 16 * 25),
        "w4": u(ks[6], (84, 120), 120),    # Linear(120, 84), PyTorch (out, in)
        "b4": u(ks[7], (84,), 120),
        "w5": u(ks[8], (n_out, 84), 84),   # Linear(84, n_out), PyTorch (out, in)
        "b5": u(ks[9], (n_out,), 84),
    }


def prepare_lenet_params(p):
    """One-time cast/reshape of the f32 PyTorch-layout params into kernel dtypes."""
    def wmat(w):                                          # (OC, C, k, k) -> (OC, C*k*k) bf16
        return w.reshape(w.shape[0], -1).astype(jnp.bfloat16)

    def bcol(b):                                          # (OC,) -> (OC, 1) f32
        return b.reshape(-1, 1).astype(jnp.float32)

    return {
        "w1": wmat(p["w1"]), "b1": bcol(p["b1"]),
        "w2": wmat(p["w2"]), "b2": bcol(p["b2"]),
        "w3": wmat(p["w3"]), "b3": bcol(p["b3"]),
        "w4": p["w4"].astype(jnp.bfloat16), "b4": bcol(p["b4"]),
        "w5": p["w5"].astype(jnp.bfloat16), "b5": bcol(p["b5"]),
    }


def lenet_forward(kparams, x):
    """x: (B, in_ch, 32, 32) NCHW f32 -> (B, n_out) f32 logits (matches PyTorch)."""
    # Single layout change + single bf16 cast at the model boundary.
    xc = jnp.transpose(x, (1, 0, 2, 3)).astype(jnp.bfloat16)   # (C, B, H, W) bf16
    # Conv(in_ch, 6, 5) + Tanh (fused in-kernel) -> AvgPool(2, 2) (XLA)
    h = conv2d_cm(xc, kparams["w1"], kparams["b1"], k=5, act="tanh")
    h = avgpool2x2_cm(h)
    # Conv(6, 16, 5) + Tanh -> AvgPool(2, 2)
    h = conv2d_cm(h, kparams["w2"], kparams["b2"], k=5, act="tanh")
    h = avgpool2x2_cm(h)
    # Conv(16, 120, 5) -> Flatten -> Linear(120, 84) + ReLU -> Linear(84, n_out):
    # conv3 sees a 5x5 map so it is a plain matmul; the whole tail is one call.
    cols3, _, _ = _im2col_cm(h, 5)                        # (16*25, B) bf16
    logits_t = tail_fused(kparams["w3"], kparams["b3"],
                          kparams["w4"], kparams["b4"],
                          kparams["w5"], kparams["b5"], cols3)
    return logits_t.T                                     # (B, n_out) f32


# ---------------------------------------------------------------------------
# Pure-JAX f32 reference (for correctness check)
# ---------------------------------------------------------------------------
def lenet_reference(params, x):
    dn = ("NCHW", "OIHW", "NCHW")

    def pool(h):
        B, C, H, W = h.shape
        return h.reshape(B, C, H // 2, 2, W // 2, 2).mean(axis=(3, 5))

    h = jax.lax.conv_general_dilated(x, params["w1"], (1, 1), "VALID",
                                     dimension_numbers=dn)
    h = jnp.tanh(h + params["b1"][None, :, None, None])
    h = pool(h)
    h = jax.lax.conv_general_dilated(h, params["w2"], (1, 1), "VALID",
                                     dimension_numbers=dn)
    h = jnp.tanh(h + params["b2"][None, :, None, None])
    h = pool(h)
    h = jax.lax.conv_general_dilated(h, params["w3"], (1, 1), "VALID",
                                     dimension_numbers=dn)
    h = h + params["b3"][None, :, None, None]
    h = h.reshape(h.shape[0], -1)
    h = jnp.maximum(h @ params["w4"].T + params["b4"], 0.0)
    return h @ params["w5"].T + params["b5"]


if __name__ == "__main__":
    # LeNet topology requires 32x32 spatial input (so conv3 sees a 5x5 map).
    B, IN_CH, N_OUT = 2, 1, 10
    key = jax.random.PRNGKey(0)
    k_x, k_p = jax.random.split(key)
    x = jax.random.normal(k_x, (B, IN_CH, 32, 32), jnp.float32)
    params = init_lenet_params(k_p, IN_CH, N_OUT)
    kparams = prepare_lenet_params(params)       # pre-cast once, outside the jit

    fwd = jax.jit(lenet_forward)
    out = jax.block_until_ready(fwd(kparams, x))
    assert out.shape == (B, N_OUT), out.shape
    assert bool(jnp.all(jnp.isfinite(out)))

    ref = lenet_reference(params, x)
    # bf16 activations/weights on the MXU with f32 accumulation -> loose tolerance.
    assert bool(jnp.allclose(out, ref, atol=5e-2, rtol=5e-2)), (
        jnp.max(jnp.abs(out - ref)))
    print("KERNEL_OK")
</pallas_src>

<mosaic_0001>
module attributes {stable_mosaic.version = 11 : i64} {
  func.func @_convmm_kernel(%arg0: i32, %arg1: memref<6x25xbf16, #tpu.memory_space<vmem>>, %arg2: memref<6x1xf32, #tpu.memory_space<vmem>>, %arg3: memref<25x896xbf16, #tpu.memory_space<vmem>>, %arg4: memref<6x896xbf16, #tpu.memory_space<vmem>>) attributes {dimension_semantics = [#tpu.dimension_semantics<parallel>], iteration_bounds = array<i64: 2>, scalar_prefetch = 0 : i64, scratch_operands = 0 : i64, tpu.core_type = #tpu.core_type<tc>, window_params = [{pipeline_mode = #tpu.pipeline_mode<synchronous>, transform_indices = @transform_0, window_bounds = array<i64: 6, 25>}, {pipeline_mode = #tpu.pipeline_mode<synchronous>, transform_indices = @transform_1, window_bounds = array<i64: 6, 1>}, {transform_indices = @transform_2, window_bounds = array<i64: 25, 896>}, {transform_indices = @transform_3, window_bounds = array<i64: 6, 896>}]} {
    %c0 = arith.constant 0 : index
    %c0_0 = arith.constant 0 : index
    %0 = vector.load %arg1[%c0, %c0_0] : memref<6x25xbf16, #tpu.memory_space<vmem>>, vector<6x25xbf16>
    %c0_1 = arith.constant 0 : index
    %c0_2 = arith.constant 0 : index
    %1 = vector.load %arg3[%c0_1, %c0_2] : memref<25x896xbf16, #tpu.memory_space<vmem>>, vector<25x896xbf16>
    %cst = arith.constant dense<0.000000e+00> : vector<6x896xf32>
    %2 = tpu.matmul %0, %1, %cst {dimension_numbers = #tpu.dot_dimension_numbers<[1], [0], [0], [1], [0, 0, 1, 1], [], []>} : vector<6x25xbf16>, vector<25x896xbf16>, vector<6x896xf32> -> vector<6x896xf32>
    %c0_3 = arith.constant 0 : index
    %c0_4 = arith.constant 0 : index
    %3 = vector.load %arg2[%c0_3, %c0_4] : memref<6x1xf32, #tpu.memory_space<vmem>>, vector<6x1xf32>
    %4 = vector.broadcast %3 : vector<6x1xf32> to vector<6x896xf32>
    %5 = arith.addf %2, %4 : vector<6x896xf32>
    %6 = math.tanh %5 : vector<6x896xf32>
    %7 = arith.truncf %6 : vector<6x896xf32> to vector<6x896xbf16>
    %c0_5 = arith.constant 0 : index
    %c0_6 = arith.constant 0 : index
    %8 = vector.load %arg4[%c0_5, %c0_6] : memref<6x896xbf16, #tpu.memory_space<vmem>>, vector<6x896xbf16>
    tpu.vector_store %arg4[%c0_5, %c0_6], %7 {strides = array<i32>} : memref<6x896xbf16, #tpu.memory_space<vmem>>, vector<6x896xbf16>,
    return
  }
  func.func @transform_0(%arg0: i32) -> (i32, i32) {
    %c0_i32 = arith.constant 0 : i32
    %c0_i32_0 = arith.constant 0 : i32
    %c0_i32_1 = arith.constant 0 : i32
    return %c0_i32, %c0_i32_0 : i32, i32
  }
  func.func @transform_1(%arg0: i32) -> (i32, i32) {
    %c0_i32 = arith.constant 0 : i32
    %c0_i32_0 = arith.constant 0 : i32
    %c0_i32_1 = arith.constant 0 : i32
    return %c0_i32, %c0_i32_0 : i32, i32
  }
  func.func @transform_2(%arg0: i32) -> (i32, i32) {
    %c0_i32 = arith.constant 0 : i32
    %c0_i32_0 = arith.constant 0 : i32
    return %c0_i32, %arg0 : i32, i32
  }
  func.func @transform_3(%arg0: i32) -> (i32, i32) {
    %c0_i32 = arith.constant 0 : i32
    %c0_i32_0 = arith.constant 0 : i32
    return %c0_i32, %arg0 : i32, i32
  }
}

module attributes {stable_mosaic.version = 11 : i64} {
  func.func @_convmm_kernel(%arg0: i32, %arg1: memref<16x150xbf16, #tpu.memory_space<vmem>>, %arg2: memref<16x1xf32, #tpu.memory_space<vmem>>, %arg3: memref<150x128xbf16, #tpu.memory_space<vmem>>, %arg4: memref<16x128xbf16, #tpu.memory_space<vmem>>) attributes {dimension_semantics = [#tpu.dimension_semantics<parallel>], iteration_bounds = array<i64: 2>, scalar_prefetch = 0 : i64, scratch_operands = 0 : i64, tpu.core_type = #tpu.core_type<tc>, window_params = [{pipeline_mode = #tpu.pipeline_mode<synchronous>, transform_indices = @transform_0, window_bounds = array<i64: 16, 150>}, {pipeline_mode = #tpu.pipeline_mode<synchronous>, transform_indices = @transform_1, window_bounds = array<i64: 16, 1>}, {transform_indices = @transform_2, window_bounds = array<i64: 150, 128>}, {transform_indices = @transform_3, window_bounds = array<i64: 16, 128>}]} {
    %c0 = arith.constant 0 : index
    %c0_0 = arith.constant 0 : index
    %0 = vector.load %arg1[%c0, %c0_0] : memref<16x150xbf16, #tpu.memory_space<vmem>>, vector<16x150xbf16>
    %c0_1 = arith.constant 0 : index
    %c0_2 = arith.constant 0 : index
    %1 = vector.load %arg3[%c0_1, %c0_2] : memref<150x128xbf16, #tpu.memory_space<vmem>>, vector<150x128xbf16>
    %cst = arith.constant dense<0.000000e+00> : vector<16x128xf32>
    %2 = tpu.matmul %0, %1, %cst {dimension_numbers = #tpu.dot_dimension_numbers<[1], [0], [0], [1], [0, 0, 1, 1], [], []>} : vector<16x150xbf16>, vector<150x128xbf16>, vector<16x128xf32> -> vector<16x128xf32>
    %c0_3 = arith.constant 0 : index
    %c0_4 = arith.constant 0 : index
    %3 = vector.load %arg2[%c0_3, %c0_4] : memref<16x1xf32, #tpu.memory_space<vmem>>, vector<16x1xf32>
    %4 = vector.broadcast %3 : vector<16x1xf32> to vector<16x128xf32>
    %5 = arith.addf %2, %4 : vector<16x128xf32>
    %6 = math.tanh %5 : vector<16x128xf32>
    %7 = arith.truncf %6 : vector<16x128xf32> to vector<16x128xbf16>
    %c0_5 = arith.constant 0 : index
    %c0_6 = arith.constant 0 : index
    %8 = vector.load %arg4[%c0_5, %c0_6] : memref<16x128xbf16, #tpu.memory_space<vmem>>, vector<16x128xbf16>
    tpu.vector_store %arg4[%c0_5, %c0_6], %7 {strides = array<i32>} : memref<16x128xbf16, #tpu.memory_space<vmem>>, vector<16x128xbf16>,
    return
  }
  func.func @transform_0(%arg0: i32) -> (i32, i32) {
    %c0_i32 = arith.constant 0 : i32
    %c0_i32_0 = arith.constant 0 : i32
    %c0_i32_1 = arith.constant 0 : i32
    return %c0_i32, %c0_i32_0 : i32, i32
  }
  func.func @transform_1(%arg0: i32) -> (i32, i32) {
    %c0_i32 = arith.constant 0 : i32
    %c0_i32_0 = arith.constant 0 : i32
    %c0_i32_1 = arith.constant 0 : i32
    return %c0_i32, %c0_i32_0 : i32, i32
  }
  func.func @transform_2(%arg0: i32) -> (i32, i32) {
    %c0_i32 = arith.constant 0 : i32
    %c0_i32_0 = arith.constant 0 : i32
    return %c0_i32, %arg0 : i32, i32
  }
  func.func @transform_3(%arg0: i32) -> (i32, i32) {
    %c0_i32 = arith.constant 0 : i32
    %c0_i32_0 = arith.constant 0 : i32
    return %c0_i32, %arg0 : i32, i32
  }
}

module attributes {stable_mosaic.version = 11 : i64} {
  func.func @_tail_kernel(%arg0: i32, %arg1: memref<120x400xbf16, #tpu.memory_space<vmem>>, %arg2: memref<120x1xf32, #tpu.memory_space<vmem>>, %arg3: memref<84x120xbf16, #tpu.memory_space<vmem>>, %arg4: memref<84x1xf32, #tpu.memory_space<vmem>>, %arg5: memref<10x84xbf16, #tpu.memory_space<vmem>>, %arg6: memref<10x1xf32, #tpu.memory_space<vmem>>, %arg7: memref<400x2xbf16, #tpu.memory_space<vmem>>, %arg8: memref<10x2xf32, #tpu.memory_space<vmem>>) attributes {dimension_semantics = [#tpu.dimension_semantics<parallel>], iteration_bounds = array<i64: 1>, scalar_prefetch = 0 : i64, scratch_operands = 0 : i64, tpu.core_type = #tpu.core_type<tc>, window_params = [{pipeline_mode = #tpu.pipeline_mode<synchronous>, transform_indices = @transform_0, window_bounds = array<i64: 120, 400>}, {pipeline_mode = #tpu.pipeline_mode<synchronous>, transform_indices = @transform_1, window_bounds = array<i64: 120, 1>}, {pipeline_mode = #tpu.pipeline_mode<synchronous>, transform_indices = @transform_2, window_bounds = array<i64: 84, 120>}, {pipeline_mode = #tpu.pipeline_mode<synchronous>, transform_indices = @transform_3, window_bounds = array<i64: 84, 1>}, {pipeline_mode = #tpu.pipeline_mode<synchronous>, transform_indices = @transform_4, window_bounds = array<i64: 10, 84>}, {pipeline_mode = #tpu.pipeline_mode<synchronous>, transform_indices = @transform_5, window_bounds = array<i64: 10, 1>}, {transform_indices = @transform_6, window_bounds = array<i64: 400, 2>}, {transform_indices = @transform_7, window_bounds = array<i64: 10, 2>}]} {
    %c0 = arith.constant 0 : index
    %c0_0 = arith.constant 0 : index
    %0 = vector.load %arg1[%c0, %c0_0] : memref<120x400xbf16, #tpu.memory_space<vmem>>, vector<120x400xbf16>
    %c0_1 = arith.constant 0 : index
    %c0_2 = arith.constant 0 : index
    %1 = vector.load %arg7[%c0_1, %c0_2] : memref<400x2xbf16, #tpu.memory_space<vmem>>, vector<400x2xbf16>
    %cst = arith.constant dense<0.000000e+00> : vector<120x2xf32>
    %2 = tpu.matmul %0, %1, %cst {dimension_numbers = #tpu.dot_dimension_numbers<[1], [0], [0], [1], [0, 0, 1, 1], [], []>} : vector<120x400xbf16>, vector<400x2xbf16>, vector<120x2xf32> -> vector<120x2xf32>
    %c0_3 = arith.constant 0 : index
    %c0_4 = arith.constant 0 : index
    %3 = vector.load %arg2[%c0_3, %c0_4] : memref<120x1xf32, #tpu.memory_space<vmem>>, vector<120x1xf32>
    %4 = vector.broadcast %3 : vector<120x1xf32> to vector<120x2xf32>
    %5 = arith.addf %2, %4 : vector<120x2xf32>
    %6 = arith.truncf %5 : vector<120x2xf32> to vector<120x2xbf16>
    %c0_5 = arith.constant 0 : index
    %c0_6 = arith.constant 0 : index
    %7 = vector.load %arg3[%c0_5, %c0_6] : memref<84x120xbf16, #tpu.memory_space<vmem>>, vector<84x120xbf16>
    %cst_7 = arith.constant dense<0.000000e+00> : vector<84x2xf32>
    %8 = tpu.matmul %7, %6, %cst_7 {dimension_numbers = #tpu.dot_dimension_numbers<[1], [0], [0], [1], [0, 0, 1, 1], [], []>} : vector<84x120xbf16>, vector<120x2xbf16>, vector<84x2xf32> -> vector<84x2xf32>
    %c0_8 = arith.constant 0 : index
    %c0_9 = arith.constant 0 : index
    %9 = vector.load %arg4[%c0_8, %c0_9] : memref<84x1xf32, #tpu.memory_space<vmem>>, vector<84x1xf32>
    %10 = vector.broadcast %9 : vector<84x1xf32> to vector<84x2xf32>
    %11 = arith.addf %8, %10 : vector<84x2xf32>
    %cst_10 = arith.constant 0.000000e+00 : f32
    %12 = vector.broadcast %cst_10 : f32 to vector<84x2xf32>
    %13 = arith.maximumf %11, %12 : vector<84x2xf32>
    %14 = arith.truncf %13 : vector<84x2xf32> to vector<84x2xbf16>
    %c0_11 = arith.constant 0 : index
    %c0_12 = arith.constant 0 : index
    %15 = vector.load %arg5[%c0_11, %c0_12] : memref<10x84xbf16, #tpu.memory_space<vmem>>, vector<10x84xbf16>
    %cst_13 = arith.constant dense<0.000000e+00> : vector<10x2xf32>
    %16 = tpu.matmul %15, %14, %cst_13 {dimension_numbers = #tpu.dot_dimension_numbers<[1], [0], [0], [1], [0, 0, 1, 1], [], []>} : vector<10x84xbf16>, vector<84x2xbf16>, vector<10x2xf32> -> vector<10x2xf32>
    %c0_14 = arith.constant 0 : index
    %c0_15 = arith.constant 0 : index
    %17 = vector.load %arg6[%c0_14, %c0_15] : memref<10x1xf32, #tpu.memory_space<vmem>>, vector<10x1xf32>
    %18 = vector.broadcast %17 : vector<10x1xf32> to vector<10x2xf32>
    %19 = arith.addf %16, %18 : vector<10x2xf32>
    %c0_16 = arith.constant 0 : index
    %c0_17 = arith.constant 0 : index
    %20 = vector.load %arg8[%c0_16, %c0_17] : memref<10x2xf32, #tpu.memory_space<vmem>>, vector<10x2xf32>
    tpu.vector_store %arg8[%c0_16, %c0_17], %19 {strides = array<i32>} : memref<10x2xf32, #tpu.memory_space<vmem>>, vector<10x2xf32>,
    return
  }
  func.func @transform_0(%arg0: i32) -> (i32, i32) {
    %c0_i32 = arith.constant 0 : i32
    %c0_i32_0 = arith.constant 0 : i32
    %c0_i32_1 = arith.constant 0 : i32
    return %c0_i32, %c0_i32_0 : i32, i32
  }
  func.func @transform_1(%arg0: i32) -> (i32, i32) {
    %c0_i32 = arith.constant 0 : i32
    %c0_i32_0 = arith.constant 0 : i32
    %c0_i32_1 = arith.constant 0 : i32
    return %c0_i32, %c0_i32_0 : i32, i32
  }
  func.func @transform_2(%arg0: i32) -> (i32, i32) {
    %c0_i32 = arith.constant 0 : i32
    %c0_i32_0 = arith.constant 0 : i32
    %c0_i32_1 = arith.constant 0 : i32
    return %c0_i32, %c0_i32_0 : i32, i32
  }
  func.func @transform_3(%arg0: i32) -> (i32, i32) {
    %c0_i32 = arith.constant 0 : i32
    %c0_i32_0 = arith.constant 0 : i32
    %c0_i32_1 = arith.constant 0 : i32
    return %c0_i32, %c0_i32_0 : i32, i32
  }
  func.func @transform_4(%arg0: i32) -> (i32, i32) {
    %c0_i32 = arith.constant 0 : i32
    %c0_i32_0 = arith.constant 0 : i32
    %c0_i32_1 = arith.constant 0 : i32
    return %c0_i32, %c0_i32_0 : i32, i32
  }
  func.func @transform_5(%arg0: i32) -> (i32, i32) {
    %c0_i32 = arith.constant 0 : i32
    %c0_i32_0 = arith.constant 0 : i32
    %c0_i32_1 = arith.constant 0 : i32
    return %c0_i32, %c0_i32_0 : i32, i32
  }
  func.func @transform_6(%arg0: i32) -> (i32, i32) {
    %c0_i32 = arith.constant 0 : i32
    %c0_i32_0 = arith.constant 0 : i32
    return %c0_i32, %arg0 : i32, i32
  }
  func.func @transform_7(%arg0: i32) -> (i32, i32) {
    %c0_i32 = arith.constant 0 : i32
    %c0_i32_0 = arith.constant 0 : i32
    return %c0_i32, %arg0 : i32, i32
  }
}

</mosaic_0001>

<bundles_post_ra>
// kernel: lenet_forward.3
= control target key start
LH: loop header
LB: loop body
LE: loop exit
PB: predicated region body
PF: predicated region fallthrough
CT: control target
= control target key end

     0   :  { %8 = vsyncpa [#allocation3], 0  ;;  %s2380_s12 = smov 0   ;;  %s2382_s13 = smov 0   ;;  %s3354_s0 = inlined_call_operand.hbm [shape: bf16[6,25], index: 0, kind: input, shape index: {}]   ;;  %s3355_s1 = inlined_call_operand.vmem [shape: f32[6,1], index: 1, kind: input, shape index: {}]   ;;  %s3356_s2 = inlined_call_operand.vmem [shape: bf16[25,1568], index: 2, kind: input, shape index: {}]   ;;  %s3357_s3 = inlined_call_operand.vmem [shape: bf16[6,1568], index: 3, kind: output, shape index: {}]  }
   0x1   :  { %s2384_s14 = smov 0  }
   0x2 LB: > { %s2396_s15 = sadd.s32 4294967295, %s2221_s14   ;;  %s2399_s16 = sadd.s32 1, %s2221_s14   ;;  %s2221_s14 = sphi %s2384_s14, %s3389_s14   ;;  %s2217_s13 = sphi %s2382_s13, %s3388_s13   ;;  %s2213_s12 = sphi %s2380_s12, %s3387_s12  }
   0x3   : > { %s60_s17 = ssub.s32 %s2221_s14, %s2399_s16  ;;  %s63_s18 = sadd.s32 1, %s2217_s13 }
   0x4   : > { %p61_p0 = scmp.eq.s32.totalorder %s60_s17, 0  ;;  %p70_p1 = scmp.ne.s32.totalorder %s2217_s13, %s2213_s12 }
   0x5   : > { %p71_p2 = scmp.eq.s32.totalorder %s2221_s14, 0  ;;  %p100_p3 = scmp.eq.s32.totalorder %s2396_s15, 1 }
   0x6   : > { %s2409_s19 = scalar_select %p61_p0, %s2217_s13, %s63_s18  }
   0x7   : > { %p2411_p4 = por %p71_p2, %p70_p1  ;;  %p2415_p5 = por %p100_p3, %p70_p1 }
   0x8   : > { %p1596_p6 = scmp.ge.s32.totalorder %s2221_s14, 1  ;;  %p113_p7 = scmp.lt.s32.totalorder %s2221_s14, 3 }
   0x9   : > { %s3359_s21 = scalar_select %p2415_p5, 1, 0 }
   0xa   : > { %p1715_p8 = scmp.eq.s32.totalorder %s2396_s15, 0  ;;  %p2422_p9 = pnand %p1596_p6, %p113_p7 }
   0xb   : > { %s2351_s23 = smov [#allocation2]  }
   0xc   : > { %s126_s24 = sshll.u32 %s2351_s23, 4  ;;  %p1711_p10 = pneg %p2422_p9  ;;  %s127_s24 = int_to_ptr.vmem [resolvable:$true] %s126_s24 }
   0xd   : > { %s2052_s25 = scalar_lea.vmem %s127_s24, 64  ;;  %p2060_p2 = scmp.lt.s32.totalorder %s127_s24, %s127_s24 }
   0xe   : > { %p1712_p11 = pnand %p1715_p8, %p1711_p10  ;;  %p2053_p13 = scmp.ne.s32.totalorder %s127_s24, %s2052_s25 }
   0xf   : > { %p2061_p3 = scmp.lt.s32.totalorder %s2052_s25, %s2052_s25 }
  0x10   : > { %p2043_p12 = pneg %p1712_p11 }
  0x11   : > { %p2062_p5 = por %p2061_p3, %p2060_p2 }
  0x12   : > { %p2055_p0 = pnand %p2053_p13, %p2043_p12 }
  0x14   : > { %p2056_p1 = pneg %p2055_p0 }
  0x16   : > { %p2063_p6 = pnand %p2062_p5, %p2056_p1 }
  0x18   : > { %2066 = shalt.err (!%p2063_p6)
}
  0x19   : > { %1714 = dma.hbm_to_vmem [thread:$0]  (!%p1712_p11), %s3354_s0, 64, %s127_s24, [#allocation3]  }
  0x1a   : > { %p1598_p7 = scmp.ge.s32.totalorder %s2221_s14, 2 }
  0x1c   : > { %136 = sbr.rel (%p1598_p7) target bundleno = 189 (0xbd), region = 24 }
  0x21   : > { %139 = sbr.rel (!%p2411_p4) target bundleno = 189 (0xbd), region = 28  ;;  %s141_s28 = sand.u32 (%p2411_p4), 1, %s2217_s13  }
  0x22   : > { %s144_s29 = smul.u32 (%p2411_p4), 7, %s2221_s14 }
  0x23   : > { %s1704_s30 = smul.u32 (%p2411_p4), 112, %s141_s28 }
  0x24   : > { %s145_s4 = ssub.s32 (%p2411_p4), 13, %s144_s29  ;;  %s1679_s5 = smul.u32 (%p2411_p4), 28, %s2221_s14 }
  0x25   : > { %p146_p5 = scmp.lt.s32.totalorder (%p2411_p4), %s145_s4, 7  ;;  %s2446_s11 = scalar_lea.vmem (%p2411_p4), [#allocation4], %s1704_s30  }
  0x26   : > { %s2442_s8 = scalar_lea.vmem %s3356_s2, %s1679_s5  }
  0x27   : > { %s3391_s4 = smov (!%p146_p5, %s145_s4), 7 }
  0x28   : > { %s1599_s9 = sshll.u32 %s3391_s4, 8  ;;  %s2444_s10 = sshll.u32 %s3391_s4, 2 }
  0x29   : > { %p1603_p4 = scmp.eq.s32.totalorder %s1599_s9, 0 }
  0x2a   : > { %p156_p10 = scmp.lt.u32.totalorder (!%p1603_p4), %s2444_s10, 8 }
  0x2b   : > { %155 = sbr.rel (%p1603_p4) target bundleno = 189 (0xbd), region = 32 }
  0x30   : > { %159 = sbr.rel (%p156_p10) target bundleno = 178 (0xb2), region = 36  ;;  %s2450_s17 = sand.u32 (!%p156_p10), 7, %s2444_s10  }
  0x31   : > { %p182_p11 = scmp.eq.s32.totalorder (!%p156_p10), %s2450_s17, 0  ;;  %p1604_p12 = scmp.ne.s32.totalorder (!%p156_p10), %s2450_s17, 0 }
  0x35   : > { %185 = sbr.rel (%p1604_p12) target bundleno = 112 (0x70), region = 51  ;;  %s186_s14 = sshrl.u32 (!%p1604_p12), %s2444_s10, 3 }
  0x36   : > { %s2457_s18 = sshrl.u32 (!%p1604_p12), %s186_s14, 4 }
  0x37   : > { %p1605_p13 = scmp.le.s32.totalorder (!%p1604_p12), %s2457_s18, 0 }
  0x3a   : > { %1458 = sbr.rel (%p1605_p13) target bundleno = 96 (0x60), region = 234  ;;  %s3361_s20 = smov (!%p1605_p13), %s2446_s11 }
  0x3b   : > { %s3362_s23 = smov (!%p1605_p13), %s2442_s8  ;;  %s2466_s24 = smov (!%p1605_p13), 0  }
  0x3c   : > { %s2468_s25 = smov (!%p1605_p13), 0  }
  0x3f LB: >> { %v217_v0 = vld [vmem:[%s2229_s23 + $0x48] sm:$0xff]  ;;  %v219_v1 = vld [vmem:[%s2229_s23 + $0x50] sm:$0xff]  ;;  %v221_v2 = vld [vmem:[%s2229_s23 + $0x58] sm:$0xff]  ;;  %s327_s26 = sadd.s32 1, %s2233_s24  ;;  %s193_s25 = sadd.s32 1, %s2237_s25   ;;  %s2237_s25 = sphi %s2468_s25, %s193_s25   ;;  %s2233_s24 = sphi %s2466_s24, %s3365_s24   ;;  %s2229_s23 = sphi %s3362_s23, %s3364_s23   ;;  %s2225_s20 = sphi %s3361_s20, %s3363_s20  }
  0x40   : >> { %218 = vst [vmem:[%s2225_s20 + $0x48] sm:$0xff] %v217_v0  ;;  %220 = vst [vmem:[%s2225_s20 + $0x50] sm:$0xff] %v219_v1  ;;  %v223_v3 = vld [vmem:[%s2229_s23 + $0x60] sm:$0xff]  ;;  %v225_v4 = vld [vmem:[%s2229_s23 + $0x68] sm:$0xff]  ;;  %p328_p0 = scmp.ge.s32.totalorder %s327_s26, %s2457_s18  ;;  %p192_p1 = scmp.ge.s32.totalorder %s193_s25, %s2457_s18 }
  0x41   : >> { %222 = vst [vmem:[%s2225_s20 + $0x58] sm:$0xff] %v221_v2  ;;  %v227_v5 = vld [vmem:[%s2229_s23 + $0x70] sm:$0xff]  ;;  %224 = vst [vmem:[%s2225_s20 + $0x60] sm:$0xff] %v223_v3  ;;  %v229_v6 = vld [vmem:[%s2229_s23 + $0x78] sm:$0xff] }
  0x42   : >> { %226 = vst [vmem:[%s2225_s20 + $0x68] sm:$0xff] %v225_v4  ;;  %228 = vst [vmem:[%s2225_s20 + $0x70] sm:$0xff] %v227_v5  ;;  %v211_v7 = vld [vmem:[%s2229_s23 + $0x30] sm:$0xff]  ;;  %v213_v8 = vld [vmem:[%s2229_s23 + $0x38] sm:$0xff]  ;;  %s3393_s26 = smov (%p328_p0, %s327_s26), 0 }
  0x43   : >> { %230 = vst [vmem:[%s2225_s20 + $0x78] sm:$0xff] %v229_v6  ;;  %212 = vst [vmem:[%s2225_s20 + $0x30] sm:$0xff] %v211_v7  ;;  %v215_v9 = vld [vmem:[%s2229_s23 + $0x40] sm:$0xff]  ;;  %v245_v11 = vld [vmem:[%s2229_s23 + $0x6c] sm:$0xff]  ;;  %s1606_s27 = sshll.u32 %s3393_s26, 7  ;;  %s3365_s24 = smov %s3393_s26 }
  0x44   : >> { %214 = vst [vmem:[%s2225_s20 + $0x38] sm:$0xff] %v213_v8  ;;  %v243_v10 = vld [vmem:[%s2229_s23 + $0x64] sm:$0xff]  ;;  %216 = vst [vmem:[%s2225_s20 + $0x40] sm:$0xff] %v215_v9  ;;  %v247_v12 = vld [vmem:[%s2229_s23 + $0x74] sm:$0xff]  ;;  %s2539_s28 = scalar_lea.vmem %s2442_s8, %s1606_s27   ;;  %s2542_s29 = scalar_lea.vmem %s2446_s11, %s1606_s27 [#allocation4]  }
  0x45   : >> { %244 = vst [vmem:[%s2225_s20 + $0x4c] sm:$0xff] %v243_v10  ;;  %246 = vst [vmem:[%s2225_s20 + $0x54] sm:$0xff] %v245_v11  ;;  %v249_v13 = vld [vmem:[%s2229_s23 + $0x7c] sm:$0xff]  ;;  %v251_v14 = vld [vmem:[%s2229_s23 + $0x84] sm:$0xff] }
  0x46   : >> { %248 = vst [vmem:[%s2225_s20 + $0x5c] sm:$0xff] %v247_v12  ;;  %250 = vst [vmem:[%s2225_s20 + $0x64] sm:$0xff] %v249_v13  ;;  %v253_v15 = vld [vmem:[%s2229_s23 + $0x8c] sm:$0xff]  ;;  %v255_v16 = vld [vmem:[%s2229_s23 + $0x94] sm:$0xff] }
  0x47   : >> { %252 = vst [vmem:[%s2225_s20 + $0x6c] sm:$0xff] %v251_v14  ;;  %v257_v17 = vld [vmem:[%s2229_s23 + $0x9c] sm:$0xff]  ;;  %254 = vst [vmem:[%s2225_s20 + $0x74] sm:$0xff] %v253_v15  ;;  %v259_v18 = vld [vmem:[%s2229_s23 + $0xa4] sm:$0xff] }
  0x48   : >> { %256 = vst [vmem:[%s2225_s20 + $0x7c] sm:$0xff] %v255_v16  ;;  %258 = vst [vmem:[%s2225_s20 + $0x84] sm:$0xff] %v257_v17  ;;  %v261_v19 = vld [vmem:[%s2229_s23 + $0xac] sm:$0xff]  ;;  %v205_v20 = vld [vmem:[%s2229_s23 + $0x18] sm:$0xff] }
  0x49   : >> { %260 = vst [vmem:[%s2225_s20 + $0x8c] sm:$0xff] %v259_v18  ;;  %262 = vst [vmem:[%s2225_s20 + $0x94] sm:$0xff] %v261_v19  ;;  %v207_v21 = vld [vmem:[%s2229_s23 + $0x20] sm:$0xff]  ;;  %v209_v22 = vld [vmem:[%s2229_s23 + $0x28] sm:$0xff] }
  0x4a   : >> { %206 = vst [vmem:[%s2225_s20 + $0x18] sm:$0xff] %v205_v20  ;;  %v237_v23 = vld [vmem:[%s2229_s23 + $0x4c] sm:$0xff]  ;;  %208 = vst [vmem:[%s2225_s20 + $0x20] sm:$0xff] %v207_v21  ;;  %v239_v24 = vld [vmem:[%s2229_s23 + $0x54] sm:$0xff] }
  0x4b   : >> { %210 = vst [vmem:[%s2225_s20 + $0x28] sm:$0xff] %v209_v22  ;;  %238 = vst [vmem:[%s2225_s20 + $0x34] sm:$0xff] %v237_v23  ;;  %v241_v25 = vld [vmem:[%s2229_s23 + $0x5c] sm:$0xff]  ;;  %v271_v27 = vld [vmem:[%s2229_s23 + $0x88] sm:$0xff] }
  0x4c   : >> { %v269_v26 = vld [vmem:[%s2229_s23 + $0x80] sm:$0xff]  ;;  %240 = vst [vmem:[%s2225_s20 + $0x3c] sm:$0xff] %v239_v24  ;;  %242 = vst [vmem:[%s2225_s20 + $0x44] sm:$0xff] %v241_v25  ;;  %v273_v28 = vld [vmem:[%s2229_s23 + $0x90] sm:$0xff] }
  0x4d   : >> { %270 = vst [vmem:[%s2225_s20 + $0x50] sm:$0xff] %v269_v26  ;;  %v275_v29 = vld [vmem:[%s2229_s23 + $0x98] sm:$0xff]  ;;  %272 = vst [vmem:[%s2225_s20 + $0x58] sm:$0xff] %v271_v27  ;;  %v277_v30 = vld [vmem:[%s2229_s23 + $0xa0] sm:$0xff] }
  0x4e   : >> { %274 = vst [vmem:[%s2225_s20 + $0x60] sm:$0xff] %v273_v28  ;;  %276 = vst [vmem:[%s2225_s20 + $0x68] sm:$0xff] %v275_v29  ;;  %v279_v31 = vld [vmem:[%s2229_s23 + $0xa8] sm:$0xff]  ;;  %v281_v32 = vld [vmem:[%s2229_s23 + $0xb0] sm:$0xff] }
  0x4f   : >> { %264 = vst [vmem:[%s2225_s20 + $0x38] sm:$0xff] %v225_v4  ;;  %266 = vst [vmem:[%s2225_s20 + $0x40] sm:$0xff] %v227_v5  ;;  %v283_v33 = vld [vmem:[%s2229_s23 + $0xb8] sm:$0xff]  ;;  %v285_v34 = vld [vmem:[%s2229_s23 + $0xc0] sm:$0xff] }
  0x50   : >> { %268 = vst [vmem:[%s2225_s20 + $0x48] sm:$0xff] %v229_v6  ;;  %278 = vst [vmem:[%s2225_s20 + $0x70] sm:$0xff] %v277_v30  ;;  %v287_v35 = vld [vmem:[%s2229_s23 + $0xc8] sm:$0xff]  ;;  %v289_v36 = vld [vmem:[%s2229_s23 + $0xd0] sm:$0xff] }
  0x51   : >> { %280 = vst [vmem:[%s2225_s20 + $0x78] sm:$0xff] %v279_v31  ;;  %282 = vst [vmem:[%s2225_s20 + $0x80] sm:$0xff] %v281_v32  ;;  %v291_v37 = vld [vmem:[%s2229_s23 + $0xd8] sm:$0xff]  ;;  %v293_v38 = vld [vmem:[%s2229_s23 + $0xe0] sm:$0xff] }
  0x52   : >> { %296 = vst [vmem:[%s2225_s20 + $0x54] sm:$0xff] %v257_v17  ;;  %298 = vst [vmem:[%s2225_s20 + $0x5c] sm:$0xff] %v259_v18  ;;  %v199_v39 = vld [vmem:[%s2229_s23] sm:$0xff]  ;;  %v201_v40 = vld [vmem:[%s2229_s23 + $0x8] sm:$0xff] }
  0x53   : >> { %300 = vst [vmem:[%s2225_s20 + $0x64] sm:$0xff] %v261_v19  ;;  %284 = vst [vmem:[%s2225_s20 + $0x88] sm:$0xff] %v283_v33  ;;  %v203_v41 = vld [vmem:[%s2229_s23 + $0x10] sm:$0xff]  ;;  %v233_v43 = vld [vmem:[%s2229_s23 + $0x3c] sm:$0xff] }
  0x54   : >> { %286 = vst [vmem:[%s2225_s20 + $0x90] sm:$0xff] %v285_v34  ;;  %288 = vst [vmem:[%s2225_s20 + $0x98] sm:$0xff] %v287_v35  ;;  %v231_v42 = vld [vmem:[%s2229_s23 + $0x34] sm:$0xff]  ;;  %v235_v44 = vld [vmem:[%s2229_s23 + $0x44] sm:$0xff] }
  0x55   : >> { %290 = vst [vmem:[%s2225_s20 + $0xa0] sm:$0xff] %v289_v36  ;;  %292 = vst [vmem:[%s2225_s20 + $0xa8] sm:$0xff] %v291_v37  ;;  %v301_v45 = vld [vmem:[%s2229_s23 + $0xb4] sm:$0xff]  ;;  %v303_v46 = vld [vmem:[%s2229_s23 + $0xbc] sm:$0xff] }
  0x56   : >> { %294 = vst [vmem:[%s2225_s20 + $0xb0] sm:$0xff] %v293_v38  ;;  %200 = vst [vmem:[%s2225_s20] sm:$0xff] %v199_v39  ;;  %v305_v47 = vld [vmem:[%s2229_s23 + $0xc4] sm:$0xff]  ;;  %v307_v48 = vld [vmem:[%s2229_s23 + $0xcc] sm:$0xff] }
  0x57   : >> { %202 = vst [vmem:[%s2225_s20 + $0x8] sm:$0xff] %v201_v40  ;;  %204 = vst [vmem:[%s2225_s20 + $0x10] sm:$0xff] %v203_v41  ;;  %v309_v49 = vld [vmem:[%s2229_s23 + $0xd4] sm:$0xff]  ;;  %v311_v50 = vld [vmem:[%s2229_s23 + $0xdc] sm:$0xff] }
  0x58   : >> { %232 = vst [vmem:[%s2225_s20 + $0x1c] sm:$0xff] %v231_v42  ;;  %234 = vst [vmem:[%s2225_s20 + $0x24] sm:$0xff] %v233_v43  ;;  %v313_v51 = vld [vmem:[%s2229_s23 + $0xe4] sm:$0xff]  ;;  %v315_v52 = vld [vmem:[%s2229_s23 + $0xec] sm:$0xff] }
  0x59   : >> { %236 = vst [vmem:[%s2225_s20 + $0x2c] sm:$0xff] %v235_v44  ;;  %302 = vst [vmem:[%s2225_s20 + $0x6c] sm:$0xff] %v301_v45  ;;  %v317_v53 = vld [vmem:[%s2229_s23 + $0xf4] sm:$0xff]  ;;  %v319_v54 = vld [vmem:[%s2229_s23 + $0xfc] sm:$0xff] }
  0x5a   : >> { %304 = vst [vmem:[%s2225_s20 + $0x74] sm:$0xff] %v303_v46  ;;  %306 = vst [vmem:[%s2225_s20 + $0x7c] sm:$0xff] %v305_v47  ;;  %v321_v55 = vld [vmem:[%s2229_s23 + $0x104] sm:$0xff]  ;;  %v323_v56 = vld [vmem:[%s2229_s23 + $0x10c] sm:$0xff] }
  0x5b   : >> { %308 = vst [vmem:[%s2225_s20 + $0x84] sm:$0xff] %v307_v48  ;;  %310 = vst [vmem:[%s2225_s20 + $0x8c] sm:$0xff] %v309_v49  ;;  %v325_v57 = vld [vmem:[%s2229_s23 + $0x114] sm:$0xff]  ;;  %s3364_s23 = smov %s2539_s28  ;;  %195 = sbr.rel (!%p192_p1) target bundleno = 63 (0x3f), region = 240 }
  0x5c   : >> { %312 = vst [vmem:[%s2225_s20 + $0x94] sm:$0xff] %v311_v50  ;;  %314 = vst [vmem:[%s2225_s20 + $0x9c] sm:$0xff] %v313_v51 }
  0x5d   : >> { %316 = vst [vmem:[%s2225_s20 + $0xa4] sm:$0xff] %v315_v52  ;;  %318 = vst [vmem:[%s2225_s20 + $0xac] sm:$0xff] %v317_v53 }
  0x5e   : >> { %320 = vst [vmem:[%s2225_s20 + $0xb4] sm:$0xff] %v319_v54  ;;  %322 = vst [vmem:[%s2225_s20 + $0xbc] sm:$0xff] %v321_v55 }
  0x5f   : >> { %324 = vst [vmem:[%s2225_s20 + $0xc4] sm:$0xff] %v323_v56  ;;  %326 = vst [vmem:[%s2225_s20 + $0xcc] sm:$0xff] %v325_v57  ;;  %s3363_s20 = smov %s2542_s29 }
  0x60 PF: > { %s2630_s30 = sand.u32 15, %s186_s14   ;;  %s1680_s4 = sshll.u32 %s2457_s18, 11 }
  0x61   : > { %s338_s5 = sshra.s32 %s1680_s4, 4  ;;  %p1611_p2 = scmp.le.s32.totalorder %s2630_s30, 0 }
  0x62   : > { %s2634_s6 = scalar_lea.vmem %s2442_s8, %s338_s5   ;;  %s2637_s7 = scalar_lea.vmem %s2446_s11, %s338_s5 [#allocation4]  }
  0x63   : > { %1472 = sbr.rel (%p1611_p2) target bundleno = 112 (0x70), region = 245  ;;  %s3366_s9 = smov (!%p1611_p2), %s2637_s7 }
  0x64   : > { %s3367_s20 = smov (!%p1611_p2), %s2634_s6  ;;  %s2646_s23 = smov (!%p1611_p2), 0  }
  0x65   : > { %s2251_s24 = smov (!%p1611_p2), 0  }
  0x68 LB: >> { %v354_v58 = vld [vmem:[%s2245_s20] sm:$0xff]  ;;  %v356_v59 = vld [vmem:[%s2245_s20 + $0x34] sm:$0xff]  ;;  %v358_v60 = vld [vmem:[%s2245_s20 + $0x68] sm:$0xff]  ;;  %s362_s14 = sadd.s32 1, %s2249_s23  ;;  %s348_s24 = sadd.s32 1, %s2253_s24   ;;  %s2253_s24 = sphi %s2251_s24, %s348_s24   ;;  %s2249_s23 = sphi %s2646_s23, %s3368_s23   ;;  %s2245_s20 = sphi %s3367_s20, %s367_s20   ;;  %s2241_s9 = sphi %s3366_s9, %s368_s9  }
  0x69   : >> { %355 = vst [vmem:[%s2241_s9] sm:$0xff] %v354_v58  ;;  %357 = vst [vmem:[%s2241_s9 + $0x1c] sm:$0xff] %v356_v59  ;;  %v360_v61 = vld [vmem:[%s2245_s20 + $0x9c] sm:$0xff]  ;;  %p363_p3 = scmp.ge.s32.totalorder %s362_s14, %s2630_s30  ;;  %p347_p6 = scmp.ge.s32.totalorder %s348_s24, %s2630_s30 }
  0x6a   : >> { %359 = vst [vmem:[%s2241_s9 + $0x38] sm:$0xff] %v358_v60  ;;  %361 = vst [vmem:[%s2241_s9 + $0x54] sm:$0xff] %v360_v61 }
  0x6b   : >> { %s3395_s14 = smov (%p363_p3, %s362_s14), 0  ;;  %350 = sbr.rel (!%p347_p6) target bundleno = 104 (0x68), region = 251 }
  0x6c   : >> { %s1612_s18 = sshll.u32 %s3395_s14, 3  ;;  %s3368_s23 = smov %s3395_s14 }
  0x6d   : >> { %s367_s20 = scalar_lea.vmem %s2634_s6, %s1612_s18   ;;  %s368_s9 = scalar_lea.vmem %s2637_s7, %s1612_s18 [#allocation4]  }
  0x70 PF: > { %371 = sbr.rel (%p182_p11) target bundleno = 178 (0xb2), region = 69  ;;  %s373_s25 = ssub.s32 (!%p182_p11), %s2444_s10, %s2450_s17 }
  0x71   : > { %s377_s26 = sshrl.u32 (!%p182_p11), %s2444_s10, 3  ;;  %s2667_s27 = scalar_lea.vmem (!%p182_p11), %s2442_s8, %s373_s25 }
  0x72   : > { %s2670_s28 = scalar_lea.vmem (!%p182_p11), %s2446_s11, %s373_s25 [#allocation4]  ;;  %s2674_s29 = sshrl.u32 (!%p182_p11), %s377_s26, 4 }
  0x73   : > { %p1614_p7 = scmp.le.s32.totalorder (!%p182_p11), %s2674_s29, 0 }
  0x75   : > { %1486 = sbr.rel (%p1614_p7) target bundleno = 155 (0x9b), region = 256  ;;  %s3369_s30 = smov (!%p1614_p7), %s2446_s11 }
  0x76   : > { %s3370_s4 = smov (!%p1614_p7), %s2442_s8  ;;  %s2683_s5 = smov (!%p1614_p7), 0  }
  0x77   : > { %s2685_s6 = smov (!%p1614_p7), 0  }
  0x7a LB: >> { %v408_v62 = vld [vmem:[%s2261_s4 + $0x48] sm:$0xff]  ;;  %v410_v63 = vld [vmem:[%s2261_s4 + $0x50] sm:$0xff]  ;;  %v412_v0 = vld [vmem:[%s2261_s4 + $0x58] sm:$0xff]  ;;  %s518_s7 = sadd.s32 1, %s2265_s5  ;;  %s384_s6 = sadd.s32 1, %s2269_s6   ;;  %s2269_s6 = sphi %s2685_s6, %s384_s6   ;;  %s2265_s5 = sphi %s2683_s5, %s3373_s5   ;;  %s2261_s4 = sphi %s3370_s4, %s3372_s4   ;;  %s2257_s30 = sphi %s3369_s30, %s3371_s30  }
  0x7b   : >> { %409 = vst [vmem:[%s2257_s30 + $0x48] sm:$0xff] %v408_v62  ;;  %411 = vst [vmem:[%s2257_s30 + $0x50] sm:$0xff] %v410_v63  ;;  %v414_v1 = vld [vmem:[%s2261_s4 + $0x60] sm:$0xff]  ;;  %v416_v2 = vld [vmem:[%s2261_s4 + $0x68] sm:$0xff]  ;;  %p519_p5 = scmp.ge.s32.totalorder %s518_s7, %s2674_s29  ;;  %p383_p4 = scmp.ge.s32.totalorder %s384_s6, %s2674_s29 }
  0x7c   : >> { %413 = vst [vmem:[%s2257_s30 + $0x58] sm:$0xff] %v412_v0  ;;  %v418_v3 = vld [vmem:[%s2261_s4 + $0x70] sm:$0xff]  ;;  %415 = vst [vmem:[%s2257_s30 + $0x60] sm:$0xff] %v414_v1  ;;  %v420_v4 = vld [vmem:[%s2261_s4 + $0x78] sm:$0xff] }
  0x7d   : >> { %417 = vst [vmem:[%s2257_s30 + $0x68] sm:$0xff] %v416_v2  ;;  %419 = vst [vmem:[%s2257_s30 + $0x70] sm:$0xff] %v418_v3  ;;  %v402_v5 = vld [vmem:[%s2261_s4 + $0x30] sm:$0xff]  ;;  %v404_v6 = vld [vmem:[%s2261_s4 + $0x38] sm:$0xff]  ;;  %s3397_s7 = smov (%p519_p5, %s518_s7), 0 }
  0x7e   : >> { %421 = vst [vmem:[%s2257_s30 + $0x78] sm:$0xff] %v420_v4  ;;  %403 = vst [vmem:[%s2257_s30 + $0x30] sm:$0xff] %v402_v5  ;;  %v406_v7 = vld [vmem:[%s2261_s4 + $0x40] sm:$0xff]  ;;  %v436_v9 = vld [vmem:[%s2261_s4 + $0x6c] sm:$0xff]  ;;  %s1615_s9 = sshll.u32 %s3397_s7, 7  ;;  %s3373_s5 = smov %s3397_s7 }
  0x7f   : >> { %405 = vst [vmem:[%s2257_s30 + $0x38] sm:$0xff] %v404_v6  ;;  %v434_v8 = vld [vmem:[%s2261_s4 + $0x64] sm:$0xff]  ;;  %407 = vst [vmem:[%s2257_s30 + $0x40] sm:$0xff] %v406_v7  ;;  %v438_v10 = vld [vmem:[%s2261_s4 + $0x74] sm:$0xff]  ;;  %s2756_s20 = scalar_lea.vmem %s2442_s8, %s1615_s9   ;;  %s2759_s23 = scalar_lea.vmem %s2446_s11, %s1615_s9 [#allocation4]  }
  0x80   : >> { %435 = vst [vmem:[%s2257_s30 + $0x4c] sm:$0xff] %v434_v8  ;;  %437 = vst [vmem:[%s2257_s30 + $0x54] sm:$0xff] %v436_v9  ;;  %v440_v11 = vld [vmem:[%s2261_s4 + $0x7c] sm:$0xff]  ;;  %v442_v12 = vld [vmem:[%s2261_s4 + $0x84] sm:$0xff] }
  0x81   : >> { %439 = vst [vmem:[%s2257_s30 + $0x5c] sm:$0xff] %v438_v10  ;;  %441 = vst [vmem:[%s2257_s30 + $0x64] sm:$0xff] %v440_v11  ;;  %v444_v13 = vld [vmem:[%s2261_s4 + $0x8c] sm:$0xff]  ;;  %v446_v14 = vld [vmem:[%s2261_s4 + $0x94] sm:$0xff] }
  0x82   : >> { %443 = vst [vmem:[%s2257_s30 + $0x6c] sm:$0xff] %v442_v12  ;;  %v448_v15 = vld [vmem:[%s2261_s4 + $0x9c] sm:$0xff]  ;;  %445 = vst [vmem:[%s2257_s30 + $0x74] sm:$0xff] %v444_v13  ;;  %v450_v16 = vld [vmem:[%s2261_s4 + $0xa4] sm:$0xff] }
  0x83   : >> { %447 = vst [vmem:[%s2257_s30 + $0x7c] sm:$0xff] %v446_v14  ;;  %449 = vst [vmem:[%s2257_s30 + $0x84] sm:$0xff] %v448_v15  ;;  %v452_v17 = vld [vmem:[%s2261_s4 + $0xac] sm:$0xff]  ;;  %v396_v18 = vld [vmem:[%s2261_s4 + $0x18] sm:$0xff] }
  0x84   : >> { %451 = vst [vmem:[%s2257_s30 + $0x8c] sm:$0xff] %v450_v16  ;;  %453 = vst [vmem:[%s2257_s30 + $0x94] sm:$0xff] %v452_v17  ;;  %v398_v19 = vld [vmem:[%s2261_s4 + $0x20] sm:$0xff]  ;;  %v400_v20 = vld [vmem:[%s2261_s4 + $0x28] sm:$0xff] }
  0x85   : >> { %397 = vst [vmem:[%s2257_s30 + $0x18] sm:$0xff] %v396_v18  ;;  %v428_v21 = vld [vmem:[%s2261_s4 + $0x4c] sm:$0xff]  ;;  %399 = vst [vmem:[%s2257_s30 + $0x20] sm:$0xff] %v398_v19  ;;  %v430_v22 = vld [vmem:[%s2261_s4 + $0x54] sm:$0xff] }
  0x86   : >> { %401 = vst [vmem:[%s2257_s30 + $0x28] sm:$0xff] %v400_v20  ;;  %429 = vst [vmem:[%s2257_s30 + $0x34] sm:$0xff] %v428_v21  ;;  %v432_v23 = vld [vmem:[%s2261_s4 + $0x5c] sm:$0xff]  ;;  %v462_v25 = vld [vmem:[%s2261_s4 + $0x88] sm:$0xff] }
  0x87   : >> { %v460_v24 = vld [vmem:[%s2261_s4 + $0x80] sm:$0xff]  ;;  %431 = vst [vmem:[%s2257_s30 + $0x3c] sm:$0xff] %v430_v22  ;;  %433 = vst [vmem:[%s2257_s30 + $0x44] sm:$0xff] %v432_v23  ;;  %v464_v26 = vld [vmem:[%s2261_s4 + $0x90] sm:$0xff] }
  0x88   : >> { %461 = vst [vmem:[%s2257_s30 + $0x50] sm:$0xff] %v460_v24  ;;  %v466_v27 = vld [vmem:[%s2261_s4 + $0x98] sm:$0xff]  ;;  %463 = vst [vmem:[%s2257_s30 + $0x58] sm:$0xff] %v462_v25  ;;  %v468_v28 = vld [vmem:[%s2261_s4 + $0xa0] sm:$0xff] }
  0x89   : >> { %465 = vst [vmem:[%s2257_s30 + $0x60] sm:$0xff] %v464_v26  ;;  %467 = vst [vmem:[%s2257_s30 + $0x68] sm:$0xff] %v466_v27  ;;  %v470_v29 = vld [vmem:[%s2261_s4 + $0xa8] sm:$0xff]  ;;  %v472_v30 = vld [vmem:[%s2261_s4 + $0xb0] sm:$0xff] }
  0x8a   : >> { %455 = vst [vmem:[%s2257_s30 + $0x38] sm:$0xff] %v416_v2  ;;  %457 = vst [vmem:[%s2257_s30 + $0x40] sm:$0xff] %v418_v3  ;;  %v474_v31 = vld [vmem:[%s2261_s4 + $0xb8] sm:$0xff]  ;;  %v476_v32 = vld [vmem:[%s2261_s4 + $0xc0] sm:$0xff] }
  0x8b   : >> { %459 = vst [vmem:[%s2257_s30 + $0x48] sm:$0xff] %v420_v4  ;;  %469 = vst [vmem:[%s2257_s30 + $0x70] sm:$0xff] %v468_v28  ;;  %v478_v33 = vld [vmem:[%s2261_s4 + $0xc8] sm:$0xff]  ;;  %v480_v34 = vld [vmem:[%s2261_s4 + $0xd0] sm:$0xff] }
  0x8c   : >> { %471 = vst [vmem:[%s2257_s30 + $0x78] sm:$0xff] %v470_v29  ;;  %473 = vst [vmem:[%s2257_s30 + $0x80] sm:$0xff] %v472_v30  ;;  %v482_v35 = vld [vmem:[%s2261_s4 + $0xd8] sm:$0xff]  ;;  %v484_v36 = vld [vmem:[%s2261_s4 + $0xe0] sm:$0xff] }
  0x8d   : >> { %487 = vst [vmem:[%s2257_s30 + $0x54] sm:$0xff] %v448_v15  ;;  %489 = vst [vmem:[%s2257_s30 + $0x5c] sm:$0xff] %v450_v16  ;;  %v390_v37 = vld [vmem:[%s2261_s4] sm:$0xff]  ;;  %v392_v38 = vld [vmem:[%s2261_s4 + $0x8] sm:$0xff] }
  0x8e   : >> { %491 = vst [vmem:[%s2257_s30 + $0x64] sm:$0xff] %v452_v17  ;;  %475 = vst [vmem:[%s2257_s30 + $0x88] sm:$0xff] %v474_v31  ;;  %v394_v39 = vld [vmem:[%s2261_s4 + $0x10] sm:$0xff]  ;;  %v424_v41 = vld [vmem:[%s2261_s4 + $0x3c] sm:$0xff] }
  0x8f   : >> { %477 = vst [vmem:[%s2257_s30 + $0x90] sm:$0xff] %v476_v32  ;;  %479 = vst [vmem:[%s2257_s30 + $0x98] sm:$0xff] %v478_v33  ;;  %v422_v40 = vld [vmem:[%s2261_s4 + $0x34] sm:$0xff]  ;;  %v426_v42 = vld [vmem:[%s2261_s4 + $0x44] sm:$0xff] }
  0x90   : >> { %481 = vst [vmem:[%s2257_s30 + $0xa0] sm:$0xff] %v480_v34  ;;  %483 = vst [vmem:[%s2257_s30 + $0xa8] sm:$0xff] %v482_v35  ;;  %v492_v43 = vld [vmem:[%s2261_s4 + $0xb4] sm:$0xff]  ;;  %v494_v44 = vld [vmem:[%s2261_s4 + $0xbc] sm:$0xff] }
  0x91   : >> { %485 = vst [vmem:[%s2257_s30 + $0xb0] sm:$0xff] %v484_v36  ;;  %391 = vst [vmem:[%s2257_s30] sm:$0xff] %v390_v37  ;;  %v496_v45 = vld [vmem:[%s2261_s4 + $0xc4] sm:$0xff]  ;;  %v498_v46 = vld [vmem:[%s2261_s4 + $0xcc] sm:$0xff] }
  0x92   : >> { %393 = vst [vmem:[%s2257_s30 + $0x8] sm:$0xff] %v392_v38  ;;  %395 = vst [vmem:[%s2257_s30 + $0x10] sm:$0xff] %v394_v39  ;;  %v500_v47 = vld [vmem:[%s2261_s4 + $0xd4] sm:$0xff]  ;;  %v502_v48 = vld [vmem:[%s2261_s4 + $0xdc] sm:$0xff] }
  0x93   : >> { %423 = vst [vmem:[%s2257_s30 + $0x1c] sm:$0xff] %v422_v40  ;;  %425 = vst [vmem:[%s2257_s30 + $0x24] sm:$0xff] %v424_v41  ;;  %v504_v49 = vld [vmem:[%s2261_s4 + $0xe4] sm:$0xff]  ;;  %v506_v50 = vld [vmem:[%s2261_s4 + $0xec] sm:$0xff] }
  0x94   : >> { %427 = vst [vmem:[%s2257_s30 + $0x2c] sm:$0xff] %v426_v42  ;;  %493 = vst [vmem:[%s2257_s30 + $0x6c] sm:$0xff] %v492_v43  ;;  %v508_v51 = vld [vmem:[%s2261_s4 + $0xf4] sm:$0xff]  ;;  %v510_v52 = vld [vmem:[%s2261_s4 + $0xfc] sm:$0xff] }
  0x95   : >> { %495 = vst [vmem:[%s2257_s30 + $0x74] sm:$0xff] %v494_v44  ;;  %497 = vst [vmem:[%s2257_s30 + $0x7c] sm:$0xff] %v496_v45  ;;  %v512_v53 = vld [vmem:[%s2261_s4 + $0x104] sm:$0xff]  ;;  %v514_v54 = vld [vmem:[%s2261_s4 + $0x10c] sm:$0xff] }
  0x96   : >> { %499 = vst [vmem:[%s2257_s30 + $0x84] sm:$0xff] %v498_v46  ;;  %501 = vst [vmem:[%s2257_s30 + $0x8c] sm:$0xff] %v500_v47  ;;  %v516_v55 = vld [vmem:[%s2261_s4 + $0x114] sm:$0xff]  ;;  %s3372_s4 = smov %s2756_s20  ;;  %386 = sbr.rel (!%p383_p4) target bundleno = 122 (0x7a), region = 262 }
  0x97   : >> { %503 = vst [vmem:[%s2257_s30 + $0x94] sm:$0xff] %v502_v48  ;;  %505 = vst [vmem:[%s2257_s30 + $0x9c] sm:$0xff] %v504_v49 }
  0x98   : >> { %507 = vst [vmem:[%s2257_s30 + $0xa4] sm:$0xff] %v506_v50  ;;  %509 = vst [vmem:[%s2257_s30 + $0xac] sm:$0xff] %v508_v51 }
  0x99   : >> { %511 = vst [vmem:[%s2257_s30 + $0xb4] sm:$0xff] %v510_v52  ;;  %513 = vst [vmem:[%s2257_s30 + $0xbc] sm:$0xff] %v512_v53 }
  0x9a   : >> { %515 = vst [vmem:[%s2257_s30 + $0xc4] sm:$0xff] %v514_v54  ;;  %517 = vst [vmem:[%s2257_s30 + $0xcc] sm:$0xff] %v516_v55  ;;  %s3371_s30 = smov %s2759_s23 }
  0x9b PF: > { %s2847_s24 = sand.u32 15, %s377_s26   ;;  %s1682_s14 = sshll.u32 %s2674_s29, 11 }
  0x9c   : > { %s529_s18 = sshra.s32 %s1682_s14, 4  ;;  %p1620_p10 = scmp.le.s32.totalorder %s2847_s24, 0 }
  0x9d   : > { %s2851_s25 = scalar_lea.vmem %s2442_s8, %s529_s18   ;;  %s2854_s9 = scalar_lea.vmem %s2446_s11, %s529_s18 [#allocation4]  }
  0x9e   : > { %1500 = sbr.rel (%p1620_p10) target bundleno = 171 (0xab), region = 267  ;;  %s3374_s30 = smov (!%p1620_p10), %s2854_s9 }
  0x9f   : > { %s3375_s4 = smov (!%p1620_p10), %s2851_s25  ;;  %s2279_s5 = smov (!%p1620_p10), 0  }
  0xa0   : > { %s2283_s6 = smov (!%p1620_p10), 0  }
  0xa3 LB: >> { %v545_v56 = vld [vmem:[%s2277_s4] sm:$0xff]  ;;  %v547_v57 = vld [vmem:[%s2277_s4 + $0x34] sm:$0xff]  ;;  %v549_v58 = vld [vmem:[%s2277_s4 + $0x68] sm:$0xff]  ;;  %s553_s26 = sadd.s32 1, %s2281_s5  ;;  %s539_s6 = sadd.s32 1, %s2285_s6   ;;  %s2285_s6 = sphi %s2283_s6, %s539_s6   ;;  %s2281_s5 = sphi %s2279_s5, %s2280_s5   ;;  %s2277_s4 = sphi %s3375_s4, %s558_s4   ;;  %s2273_s30 = sphi %s3374_s30, %s559_s30  }
  0xa4   : >> { %546 = vst [vmem:[%s2273_s30] sm:$0xff] %v545_v56  ;;  %548 = vst [vmem:[%s2273_s30 + $0x1c] sm:$0xff] %v547_v57  ;;  %v551_v59 = vld [vmem:[%s2277_s4 + $0x9c] sm:$0xff]  ;;  %p554_p11 = scmp.ge.s32.totalorder %s553_s26, %s2847_s24  ;;  %p538_p12 = scmp.ge.s32.totalorder %s539_s6, %s2847_s24 }
  0xa5   : >> { %550 = vst [vmem:[%s2273_s30 + $0x38] sm:$0xff] %v549_v58  ;;  %552 = vst [vmem:[%s2273_s30 + $0x54] sm:$0xff] %v551_v59 }
  0xa6   : >> { %s3399_s26 = smov (%p554_p11, %s553_s26), 0  ;;  %541 = sbr.rel (!%p538_p12) target bundleno = 163 (0xa3), region = 273 }
  0xa7   : >> { %s1621_s29 = sshll.u32 %s3399_s26, 3  ;;  %s2280_s5 = smov %s3399_s26  }
  0xa8   : >> { %s558_s4 = scalar_lea.vmem %s2851_s25, %s1621_s29   ;;  %s559_s30 = scalar_lea.vmem %s2854_s9, %s1621_s29 [#allocation4]  }
  0xab PF: > { %s2352_s7 = smov 1  }
  0xac   : > { %s560_s20 = sshll.u32 %s2352_s7, %s2450_s17 }
  0xad   : > { %s1623_s23 = sadd.s32 4294967295, %s560_s20 }
  0xae   : > { %v570_v60 = vld [vmem:[%s2667_s27] sm:%s1623_s23]  ;;  %v572_v61 = vld [vmem:[%s2667_s27 + $0x34] sm:%s1623_s23] }
  0xaf   : > { %571 = vst [vmem:[%s2670_s28] sm:%s1623_s23] %v570_v60  ;;  %573 = vst [vmem:[%s2670_s28 + $0x1c] sm:%s1623_s23] %v572_v61 }
  0xb0   : > { %v574_v62 = vld [vmem:[%s2667_s27 + $0x68] sm:%s1623_s23]  ;;  %v576_v63 = vld [vmem:[%s2667_s27 + $0x9c] sm:%s1623_s23] }
  0xb1   : > { %575 = vst [vmem:[%s2670_s28 + $0x38] sm:%s1623_s23] %v574_v62  ;;  %577 = vst [vmem:[%s2670_s28 + $0x54] sm:%s1623_s23] %v576_v63 }
  0xb2 PF: > { %p1624_p13 = scmp.ge.u32.totalorder %s2444_s10, 8 }
  0xb3   : > { %s2353_s24 = smov (!%p1624_p13), 1  }
  0xb4   : > { %162 = sbr.rel (%p1624_p13) target bundleno = 189 (0xbd), region = 40  ;;  %s163_s17 = sshll.u32 (!%p1624_p13), %s2353_s24, %s2444_s10 }
  0xb5   : > { %s1625_s14 = sadd.s32 (!%p1624_p13), 4294967295, %s163_s17 }
  0xb9   : > { %v173_v0 = vld [vmem:[%s2442_s8] sm:%s1625_s14]  ;;  %v175_v1 = vld [vmem:[%s2442_s8 + $0x34] sm:%s1625_s14] }
  0xba   : > { %174 = vst [vmem:[%s2446_s11] sm:%s1625_s14] %v173_v0  ;;  %176 = vst [vmem:[%s2446_s11 + $0x1c] sm:%s1625_s14] %v175_v1 }
  0xbb   : > { %v177_v2 = vld [vmem:[%s2442_s8 + $0x68] sm:%s1625_s14]  ;;  %v179_v3 = vld [vmem:[%s2442_s8 + $0x9c] sm:%s1625_s14] }
  0xbc   : > { %178 = vst [vmem:[%s2446_s11 + $0x38] sm:%s1625_s14] %v177_v2  ;;  %180 = vst [vmem:[%s2446_s11 + $0x54] sm:%s1625_s14] %v179_v3 }
  0xbd PF: > { %584 = sbr.rel (%p2422_p9) target bundleno = 578 (0x242), region = 94 }
  0xc2   : > { %2208 = dma.done.wait (%p1715_p8), [#allocation3], 64  }
  0xc3   : > { %2210 = vsyncadd (%p1715_p8), [#allocation3], 4294967232  ;;  %s591_s10 = sand.u32 1, %s2213_s12   ;;  %vm716_vm0 = vcmask 1043456   ;;  %v2354_v4 = vmov 0   ;;  %vm717_vm1 = vcmask 1044480  }
  0xc4   : > { %s1705_s8 = smul.u32 112, %s591_s10  ;;  %773 = vmatprep.mubr.bf16.mxu0 %v2354_v4  ;;  %814 = vmatprep.mubr.bf16.mxu1 %v2354_v4  ;;  %v2355_v5 = vmov 65535   ;;  %vm712_vm2 = vcmask 203776   ;;  %v624_v24 = vld [vmem:[#allocation2] sm:$0x7]  ;;  %v2356_v28 = vmov 0.0  }
  0xc5   : > { %v718_v6 = vsel %vm716_vm0, 4294967295, %v2355_v5  ;;  %2006 = vset.pattern.permute.xlu0 %v2354_v4  ;;  %v641_v27 = vld [vmem:[%s3355_s1] sm:$0x3f]  ;;  %vm2357_vm3 = vmmov 0   ;;  %s1706_s28 = smul.u32 28, %s591_s10  ;;  %p3376_p8 = scmp.ne.s32.totalorder %s3359_s21, 0 }
  0xc6   : > { %v719_v7 = vsel %vm717_vm1, %v718_v6, 0  ;;  %s2901_s22 = scalar_lea.vmem [#allocation4], %s1705_s8  ;;  %644 = vperm.xlu0 %2006, %v641_v27   ;;  %s951_s12 = smul.u32 (%p3376_p8), 7, %s2396_s15 }
  0xc7   : > { %v2007_v8 = vld [vmem:[%s2901_s22 + $0x3c] ss:$28 sps:$4 sm:$0x1f]   ;;  %v2009_v9 = vld [vmem:[%s2901_s22 + $0x44] ss:$28 sps:$4 sm:$0x1f]  }
  0xc8   : > { %v724_v10 = vand.u32 %v2007_v8, %v719_v7  ;;  %v2011_v11 = vld [vmem:[%s2901_s22 + $0x38] ss:$28 sps:$4 sm:$0x1f]   ;;  %v2012_v12 = vld [vmem:[%s2901_s22 + $0x40] ss:$28 sps:$4 sm:$0x1f]   ;;  %v730_v13 = vand.u32 %v2009_v9, %v719_v7 }
  0xc9   : > { %v2013_v14 = vld [vmem:[%s2901_s22 + $0x4] ss:$28 sps:$4 sm:$0xff]   ;;  %v721_v15 = vand.u32 %v2011_v11, %v719_v7  ;;  %v727_v16 = vand.u32 %v2012_v12, %v719_v7  ;;  %v2015_v17 = vld [vmem:[%s2901_s22 + $0xc] ss:$28 sps:$4 sm:$0xff]   ;;  %v2025_v29 = vld [vmem:[%s2901_s22 + $0x14] ss:$28 sps:$4 sm:$0xff]  }
  0xca   : > { %753 = vmatprep.subr.bf16.mxu0 %v724_v10  ;;  %794 = vmatprep.subr.bf16.mxu1 %v730_v13  ;;  %v2017_v18 = vld [vmem:[%s2901_s22] ss:$28 sps:$4 sm:$0xff]   ;;  %v2018_v19 = vld [vmem:[%s2901_s22 + $0x8] ss:$28 sps:$4 sm:$0xff]   ;;  %v2023_v30 = vld [vmem:[%s2901_s22 + $0x10] ss:$28 sps:$4 sm:$0xff]  }
  0xcb   : > { %754 = vmatpush1.bf16.msra.mxu0 %v721_v15  ;;  %795 = vmatpush1.bf16.msra.mxu1 %v727_v16  ;;  %v2019_v20 = vld [vmem:[%s2901_s22 + $0x48] ss:$28 sps:$4 sm:$0x1f]   ;;  %v2022_v22 = vld [vmem:[%s2901_s22 + $0x50] ss:$28 sps:$4 sm:$0x1f]  }
  0xcc   : > { %755 = vmatprep.subr.bf16.mxu0 %v2013_v14  ;;  %796 = vmatprep.subr.bf16.mxu1 %v2015_v17  ;;  %v2021_v21 = vld [vmem:[%s2901_s22 + $0x4c] ss:$28 sps:$4 sm:$0x1f]   ;;  %v733_v25 = vand.u32 %v2019_v20, %v719_v7  ;;  %v739_v26 = vand.u32 %v2022_v22, %v719_v7  ;;  %v2026_v31 = vld [vmem:[%s2901_s22 + $0x18] ss:$28 sps:$4 sm:$0xff]   ;;  %s2926_s18 = scalar_lea.vmem [#allocation5], %s1706_s28  }
  0xcd   : > { %v736_v23 = vand.u32 %v2021_v21, %v719_v7  ;;  %s1688_s25 = smul.u32 (%p3376_p8), 28, %s2396_s15  ;;  %s952_s9 = ssub.s32 (%p3376_p8), 13, %s951_s12 }
  0xce   : > { %p953_p9 = scmp.lt.s32.totalorder (%p3376_p8), %s952_s9, 7 }
  0xcf   : > { %756 = vmatpush1.bf16.msra.mxu0 %v2017_v18  ;;  %797 = vmatpush1.bf16.msra.mxu1 %v2018_v19  ;;  %s2939_s5 = scalar_lea.vmem (%p3376_p8), %s3357_s3, %s1688_s25  }
  0xd0   : > { %835 = vmatprep.subr.bf16.mxu0 %v736_v23  ;;  %1696 = vmatprep.subr.bf16.mxu1 %v2356_v28 }
  0xd2   : > { %1642 = vmatmul.mubr.msk.bf16.vlgmr.msra.gmra.mxu0 %vm712_vm2, %v624_v24  ;;  %1643 = vmatmul.mubr.msk.bf16.vlgmr.msra.gmra.mxu1 %vm712_vm2, %v624_v24 }
  0xd3   : > { %836 = vmatpush1.bf16.msra.mxu0 %v733_v25  ;;  %1697 = vmatpush3.bf16.msra.mxu1 %v739_v26 }
  0xd4   : > { %837 = vmatprep.subr.bf16.mxu0 %v2025_v29  ;;  %1698 = vmatprep.subr.bf16.mxu1 %v2356_v28 }
  0xd5   : > { %855 = vmatprep.mubr.bf16.mxu0 %v2354_v4  ;;  %1700 = vmatprep.mubr.msk.bf16.mxu1 %vm2357_vm3, %v2356_v28 }
  0xd7   : > { %838 = vmatpush1.bf16.msra.mxu0 %v2023_v30  ;;  %1699 = vmatpush3.bf16.msra.mxu1 %v2026_v31 }
  0xda   : > { %1644 = vmatmul.mubr.msk.bf16.vlgmr.msra.gmra.mxu0 %vm712_vm2, %v624_v24  ;;  %1701 = vmatmul.mubr.msk.bf16.vlgmr.msra.gmra.mxu1 %vm712_vm2, %v624_v24 }
 0x141   : > { %v645_v32 = vpop.permute.xlu0 %644 }
 0x192   : > { %v775_v33 = vpop.f32.mrf.mxu0  ;;  %v816_v34 = vpop.f32.mrf.mxu1 }
 0x193   : > { %v776_v35 = vadd.f32 %v775_v33, %v645_v32  ;;  %v817_v36 = vadd.f32 %v816_v34, %v645_v32 }
 0x194   : > { %v777_v37 = vpop.f32.mrf.mxu0  ;;  %v818_v38 = vpop.f32.mrf.mxu1 }
 0x195   : > { %2027 = vtanh.f32 %v776_v35  ;;  %v778_v39 = vadd.f32 %v777_v37, %v645_v32  ;;  %v819_v40 = vadd.f32 %v818_v38, %v645_v32 }
 0x196   : > { %2029 = vtanh.f32 %v817_v36  ;;  %v779_v41 = vpop.f32.mrf.mxu0  ;;  %v820_v42 = vpop.f32.mrf.mxu1 }
 0x197   : > { %2031 = vtanh.f32 %v778_v39 }
 0x198   : > { %2033 = vtanh.f32 %v819_v40  ;;  %v780_v43 = vpop.f32.mrf.mxu0  ;;  %v821_v44 = vpop.f32.mrf.mxu1 }
 0x19a   : > { %v857_v45 = vpop.f32.mrf.mxu0  ;;  %v898_v46 = vpop.f32.mrf.mxu1 }
 0x19b   : > { %v858_v47 = vadd.f32 %v857_v45, %v645_v32  ;;  %v899_v48 = vadd.f32 %v898_v46, %v645_v32 }
 0x19c   : > { %v859_v49 = vpop.f32.mrf.mxu0  ;;  %v1702_v50 = vpop.f32.mrf.mxu1 }
 0x19d   : > { %2035 = vtanh.f32 %v858_v47  ;;  %v860_v51 = vadd.f32 %v859_v49, %v645_v32 }
 0x19e   : > { %2037 = vtanh.f32 %v899_v48  ;;  %v861_v52 = vpop.f32.mrf.mxu0  ;;  %v901_v53 = vpop.f32.mrf.mxu1 }
 0x19f   : > { %2039 = vtanh.f32 %v860_v51 }
 0x1a0   : > { %v862_v54 = vpop.f32.mrf.mxu0  ;;  %v1703_v55 = vpop.f32.mrf.mxu1 }
 0x1a2   : > { %v2028_v56 = vpop.eup %2027 }
 0x1a3   : > { %v2030_v57 = vpop.eup %2029 }
 0x1a4   : > { %v2032_v58 = vpop.eup %2031 }
 0x1a5   : > { %v2034_v59 = vpop.eup %2033  ;;  %v1684_v60 = vpack.c.bf16 %v2032_v58, %v2028_v56 }
 0x1a6   : > { %v1685_v61 = vpack.c.bf16 %v2034_v59, %v2030_v57 }
 0x1a7   : > { %940 = vst [vmem:[%s2926_s18] sm:$0x77] %v1684_v60 }
 0x1a8   : > { %941 = vst [vmem:[%s2926_s18 + $0x8] sm:$0x77] %v1685_v61 }
 0x1aa   : > { %v2036_v62 = vpop.eup %2035 }
 0x1ab   : > { %v2038_v63 = vpop.eup %2037  ;;  %950 = sbr.rel (!%p3376_p8) target bundleno = 578 (0x242), region = 106 }
 0x1ac   : > { %v2040_v0 = vpop.eup %2039  ;;  %v1687_v1 = vpack.c.bf16 %v2038_v63, %v2038_v63 }
 0x1ad   : > { %v1686_v2 = vpack.c.bf16 %v2040_v0, %v2036_v62 }
 0x1ae   : > { %943 = vst [vmem:[%s2926_s18 + $0x18] sm:$0x7] %v1687_v1 }
 0x1af   : > { %942 = vst [vmem:[%s2926_s18 + $0x10] sm:$0x77] %v1686_v2 }
 0x1b0   : > { %s3401_s9 = smov (!%p953_p9, %s952_s9), 7 }
 0x1b1   : > { %s1650_s6 = sshll.u32 %s3401_s9, 6  ;;  %s2941_s26 = sshll.u32 %s3401_s9, 2 }
 0x1b2   : > { %p1654_p0 = scmp.eq.s32.totalorder %s1650_s6, 0 }
 0x1b3   : > { %p963_p1 = scmp.lt.u32.totalorder (!%p1654_p0), %s2941_s26, 8 }
 0x1b4   : > { %962 = sbr.rel (%p1654_p0) target bundleno = 578 (0x242), region = 110 }
 0x1b9   : > { %966 = sbr.rel (%p963_p1) target bundleno = 569 (0x239), region = 114  ;;  %s2945_s21 = sand.u32 (!%p963_p1), 7, %s2941_s26  }
 0x1ba   : > { %p983_p2 = scmp.eq.s32.totalorder (!%p963_p1), %s2945_s21, 0  ;;  %p1655_p3 = scmp.ne.s32.totalorder (!%p963_p1), %s2945_s21, 0 }
 0x1be   : > { %986 = sbr.rel (%p1655_p3) target bundleno = 505 (0x1f9), region = 129  ;;  %s987_s15 = sshrl.u32 (!%p1655_p3), %s2941_s26, 3 }
 0x1bf   : > { %s2952_s29 = sshrl.u32 (!%p1655_p3), %s987_s15, 6 }
 0x1c0   : > { %p1656_p6 = scmp.le.s32.totalorder (!%p1655_p3), %s2952_s29, 0 }
 0x1c3   : > { %1514 = sbr.rel (%p1656_p6) target bundleno = 489 (0x1e9), region = 278  ;;  %s3377_s7 = smov (!%p1656_p6), %s2939_s5 }
 0x1c4   : > { %s3378_s20 = smov (!%p1656_p6), %s2926_s18  ;;  %s2961_s23 = smov (!%p1656_p6), 0  }
 0x1c5   : > { %s2963_s24 = smov (!%p1656_p6), 0  }
 0x1c8 LB: >> { %v1000_v3 = vld [vmem:[%s2293_s20] sm:$0xff]  ;;  %v1002_v4 = vld [vmem:[%s2293_s20 + $0x8] sm:$0xff]  ;;  %v1004_v5 = vld [vmem:[%s2293_s20 + $0x10] sm:$0xff]  ;;  %s1128_s17 = sadd.s32 1, %s2297_s23  ;;  %s994_s24 = sadd.s32 1, %s2301_s24   ;;  %s2301_s24 = sphi %s2963_s24, %s994_s24   ;;  %s2297_s23 = sphi %s2961_s23, %s3381_s23   ;;  %s2293_s20 = sphi %s3378_s20, %s3380_s20   ;;  %s2289_s7 = sphi %s3377_s7, %s3379_s7  }
 0x1c9   : >> { %1001 = vst [vmem:[%s2289_s7] sm:$0xff] %v1000_v3  ;;  %1003 = vst [vmem:[%s2289_s7 + $0x8] sm:$0xff] %v1002_v4  ;;  %v1006_v6 = vld [vmem:[%s2293_s20 + $0x18] sm:$0xff]  ;;  %v1008_v7 = vld [vmem:[%s2293_s20 + $0x20] sm:$0xff]  ;;  %p1129_p7 = scmp.ge.s32.totalorder %s1128_s17, %s2952_s29  ;;  %p993_p5 = scmp.ge.s32.totalorder %s994_s24, %s2952_s29 }
 0x1ca   : >> { %1005 = vst [vmem:[%s2289_s7 + $0x10] sm:$0xff] %v1004_v5  ;;  %v1010_v8 = vld [vmem:[%s2293_s20 + $0x28] sm:$0xff]  ;;  %1007 = vst [vmem:[%s2289_s7 + $0x18] sm:$0xff] %v1006_v6  ;;  %v1012_v9 = vld [vmem:[%s2293_s20 + $0x30] sm:$0xff] }
 0x1cb   : >> { %1009 = vst [vmem:[%s2289_s7 + $0x20] sm:$0xff] %v1008_v7  ;;  %1011 = vst [vmem:[%s2289_s7 + $0x28] sm:$0xff] %v1010_v8  ;;  %v1014_v10 = vld [vmem:[%s2293_s20 + $0x38] sm:$0xff]  ;;  %v1016_v11 = vld [vmem:[%s2293_s20 + $0x40] sm:$0xff]  ;;  %s3403_s17 = smov (%p1129_p7, %s1128_s17), 0 }
 0x1cc   : >> { %1013 = vst [vmem:[%s2289_s7 + $0x30] sm:$0xff] %v1012_v9  ;;  %1015 = vst [vmem:[%s2289_s7 + $0x38] sm:$0xff] %v1014_v10  ;;  %v1018_v12 = vld [vmem:[%s2293_s20 + $0x48] sm:$0xff]  ;;  %v1020_v13 = vld [vmem:[%s2293_s20 + $0x50] sm:$0xff]  ;;  %s1657_s14 = sshll.u32 %s3403_s17, 9  ;;  %s3381_s23 = smov %s3403_s17 }
 0x1cd   : >> { %1017 = vst [vmem:[%s2289_s7 + $0x40] sm:$0xff] %v1016_v11  ;;  %v1022_v14 = vld [vmem:[%s2293_s20 + $0x58] sm:$0xff]  ;;  %1019 = vst [vmem:[%s2289_s7 + $0x48] sm:$0xff] %v1018_v12  ;;  %v1024_v15 = vld [vmem:[%s2293_s20 + $0x60] sm:$0xff]  ;;  %s3019_s10 = scalar_lea.vmem %s2926_s18, %s1657_s14 [#allocation5]   ;;  %s3022_s8 = scalar_lea.vmem %s2939_s5, %s1657_s14  }
 0x1ce   : >> { %1021 = vst [vmem:[%s2289_s7 + $0x50] sm:$0xff] %v1020_v13  ;;  %1023 = vst [vmem:[%s2289_s7 + $0x58] sm:$0xff] %v1022_v14  ;;  %v1026_v16 = vld [vmem:[%s2293_s20 + $0x68] sm:$0xff]  ;;  %v1028_v17 = vld [vmem:[%s2293_s20 + $0x70] sm:$0xff] }
 0x1cf   : >> { %1025 = vst [vmem:[%s2289_s7 + $0x60] sm:$0xff] %v1024_v15  ;;  %1027 = vst [vmem:[%s2289_s7 + $0x68] sm:$0xff] %v1026_v16  ;;  %v1030_v18 = vld [vmem:[%s2293_s20 + $0x78] sm:$0xff]  ;;  %v1032_v19 = vld [vmem:[%s2293_s20 + $0x80] sm:$0xff] }
 0x1d0   : >> { %1029 = vst [vmem:[%s2289_s7 + $0x70] sm:$0xff] %v1028_v17  ;;  %v1034_v20 = vld [vmem:[%s2293_s20 + $0x88] sm:$0xff]  ;;  %1031 = vst [vmem:[%s2289_s7 + $0x78] sm:$0xff] %v1030_v18  ;;  %v1036_v21 = vld [vmem:[%s2293_s20 + $0x90] sm:$0xff] }
 0x1d1   : >> { %1033 = vst [vmem:[%s2289_s7 + $0x80] sm:$0xff] %v1032_v19  ;;  %1035 = vst [vmem:[%s2289_s7 + $0x88] sm:$0xff] %v1034_v20  ;;  %v1038_v22 = vld [vmem:[%s2293_s20 + $0x98] sm:$0xff]  ;;  %v1040_v23 = vld [vmem:[%s2293_s20 + $0xa0] sm:$0xff] }
 0x1d2   : >> { %1037 = vst [vmem:[%s2289_s7 + $0x90] sm:$0xff] %v1036_v21  ;;  %1039 = vst [vmem:[%s2289_s7 + $0x98] sm:$0xff] %v1038_v22  ;;  %v1042_v24 = vld [vmem:[%s2293_s20 + $0xa8] sm:$0xff]  ;;  %v1044_v25 = vld [vmem:[%s2293_s20 + $0xb0] sm:$0xff] }
 0x1d3   : >> { %1041 = vst [vmem:[%s2289_s7 + $0xa0] sm:$0xff] %v1040_v23  ;;  %v1046_v26 = vld [vmem:[%s2293_s20 + $0xb8] sm:$0xff]  ;;  %1043 = vst [vmem:[%s2289_s7 + $0xa8] sm:$0xff] %v1042_v24  ;;  %v1048_v27 = vld [vmem:[%s2293_s20 + $0xc0] sm:$0xff] }
 0x1d4   : >> { %1045 = vst [vmem:[%s2289_s7 + $0xb0] sm:$0xff] %v1044_v25  ;;  %1047 = vst [vmem:[%s2289_s7 + $0xb8] sm:$0xff] %v1046_v26  ;;  %v1050_v28 = vld [vmem:[%s2293_s20 + $0xc8] sm:$0xff]  ;;  %v1052_v29 = vld [vmem:[%s2293_s20 + $0xd0] sm:$0xff] }
 0x1d5   : >> { %1049 = vst [vmem:[%s2289_s7 + $0xc0] sm:$0xff] %v1048_v27  ;;  %1051 = vst [vmem:[%s2289_s7 + $0xc8] sm:$0xff] %v1050_v28  ;;  %v1054_v30 = vld [vmem:[%s2293_s20 + $0xd8] sm:$0xff]  ;;  %v1056_v31 = vld [vmem:[%s2293_s20 + $0xe0] sm:$0xff] }
 0x1d6   : >> { %1053 = vst [vmem:[%s2289_s7 + $0xd0] sm:$0xff] %v1052_v29  ;;  %v1058_v32 = vld [vmem:[%s2293_s20 + $0xe8] sm:$0xff]  ;;  %1055 = vst [vmem:[%s2289_s7 + $0xd8] sm:$0xff] %v1054_v30  ;;  %v1060_v33 = vld [vmem:[%s2293_s20 + $0xf0] sm:$0xff] }
 0x1d7   : >> { %1057 = vst [vmem:[%s2289_s7 + $0xe0] sm:$0xff] %v1056_v31  ;;  %1059 = vst [vmem:[%s2289_s7 + $0xe8] sm:$0xff] %v1058_v32  ;;  %v1062_v34 = vld [vmem:[%s2293_s20 + $0xf8] sm:$0xff]  ;;  %v1064_v35 = vld [vmem:[%s2293_s20 + $0x100] sm:$0xff] }
 0x1d8   : >> { %1061 = vst [vmem:[%s2289_s7 + $0xf0] sm:$0xff] %v1060_v33  ;;  %1063 = vst [vmem:[%s2289_s7 + $0xf8] sm:$0xff] %v1062_v34  ;;  %v1066_v36 = vld [vmem:[%s2293_s20 + $0x108] sm:$0xff]  ;;  %v1068_v37 = vld [vmem:[%s2293_s20 + $0x110] sm:$0xff] }
 0x1d9   : >> { %1065 = vst [vmem:[%s2289_s7 + $0x100] sm:$0xff] %v1064_v35  ;;  %v1070_v38 = vld [vmem:[%s2293_s20 + $0x118] sm:$0xff]  ;;  %1067 = vst [vmem:[%s2289_s7 + $0x108] sm:$0xff] %v1066_v36  ;;  %v1072_v39 = vld [vmem:[%s2293_s20 + $0x120] sm:$0xff] }
 0x1da   : >> { %1069 = vst [vmem:[%s2289_s7 + $0x110] sm:$0xff] %v1068_v37  ;;  %1071 = vst [vmem:[%s2289_s7 + $0x118] sm:$0xff] %v1070_v38  ;;  %v1074_v40 = vld [vmem:[%s2293_s20 + $0x128] sm:$0xff]  ;;  %v1076_v41 = vld [vmem:[%s2293_s20 + $0x130] sm:$0xff] }
 0x1db   : >> { %1073 = vst [vmem:[%s2289_s7 + $0x120] sm:$0xff] %v1072_v39  ;;  %1075 = vst [vmem:[%s2289_s7 + $0x128] sm:$0xff] %v1074_v40  ;;  %v1078_v42 = vld [vmem:[%s2293_s20 + $0x138] sm:$0xff]  ;;  %v1080_v43 = vld [vmem:[%s2293_s20 + $0x140] sm:$0xff] }
 0x1dc   : >> { %1077 = vst [vmem:[%s2289_s7 + $0x130] sm:$0xff] %v1076_v41  ;;  %v1082_v44 = vld [vmem:[%s2293_s20 + $0x148] sm:$0xff]  ;;  %1079 = vst [vmem:[%s2289_s7 + $0x138] sm:$0xff] %v1078_v42  ;;  %v1084_v45 = vld [vmem:[%s2293_s20 + $0x150] sm:$0xff] }
 0x1dd   : >> { %1081 = vst [vmem:[%s2289_s7 + $0x140] sm:$0xff] %v1080_v43  ;;  %1083 = vst [vmem:[%s2289_s7 + $0x148] sm:$0xff] %v1082_v44  ;;  %v1086_v46 = vld [vmem:[%s2293_s20 + $0x158] sm:$0xff]  ;;  %v1088_v47 = vld [vmem:[%s2293_s20 + $0x160] sm:$0xff] }
 0x1de   : >> { %1085 = vst [vmem:[%s2289_s7 + $0x150] sm:$0xff] %v1084_v45  ;;  %1087 = vst [vmem:[%s2289_s7 + $0x158] sm:$0xff] %v1086_v46  ;;  %v1090_v48 = vld [vmem:[%s2293_s20 + $0x168] sm:$0xff]  ;;  %v1092_v49 = vld [vmem:[%s2293_s20 + $0x170] sm:$0xff] }
 0x1df   : >> { %1089 = vst [vmem:[%s2289_s7 + $0x160] sm:$0xff] %v1088_v47  ;;  %v1094_v50 = vld [vmem:[%s2293_s20 + $0x178] sm:$0xff]  ;;  %1091 = vst [vmem:[%s2289_s7 + $0x168] sm:$0xff] %v1090_v48  ;;  %v1096_v51 = vld [vmem:[%s2293_s20 + $0x180] sm:$0xff] }
 0x1e0   : >> { %1093 = vst [vmem:[%s2289_s7 + $0x170] sm:$0xff] %v1092_v49  ;;  %1095 = vst [vmem:[%s2289_s7 + $0x178] sm:$0xff] %v1094_v50  ;;  %v1098_v52 = vld [vmem:[%s2293_s20 + $0x188] sm:$0xff]  ;;  %v1100_v53 = vld [vmem:[%s2293_s20 + $0x190] sm:$0xff] }
 0x1e1   : >> { %1097 = vst [vmem:[%s2289_s7 + $0x180] sm:$0xff] %v1096_v51  ;;  %1099 = vst [vmem:[%s2289_s7 + $0x188] sm:$0xff] %v1098_v52  ;;  %v1102_v54 = vld [vmem:[%s2293_s20 + $0x198] sm:$0xff]  ;;  %v1104_v55 = vld [vmem:[%s2293_s20 + $0x1a0] sm:$0xff] }
 0x1e2   : >> { %1101 = vst [vmem:[%s2289_s7 + $0x190] sm:$0xff] %v1100_v53  ;;  %v1106_v56 = vld [vmem:[%s2293_s20 + $0x1a8] sm:$0xff]  ;;  %1103 = vst [vmem:[%s2289_s7 + $0x198] sm:$0xff] %v1102_v54  ;;  %v1108_v57 = vld [vmem:[%s2293_s20 + $0x1b0] sm:$0xff] }
 0x1e3   : >> { %1105 = vst [vmem:[%s2289_s7 + $0x1a0] sm:$0xff] %v1104_v55  ;;  %1107 = vst [vmem:[%s2289_s7 + $0x1a8] sm:$0xff] %v1106_v56  ;;  %v1110_v58 = vld [vmem:[%s2293_s20 + $0x1b8] sm:$0xff]  ;;  %v1112_v59 = vld [vmem:[%s2293_s20 + $0x1c0] sm:$0xff] }
 0x1e4   : >> { %1109 = vst [vmem:[%s2289_s7 + $0x1b0] sm:$0xff] %v1108_v57  ;;  %1111 = vst [vmem:[%s2289_s7 + $0x1b8] sm:$0xff] %v1110_v58  ;;  %v1114_v60 = vld [vmem:[%s2293_s20 + $0x1c8] sm:$0xff]  ;;  %v1116_v61 = vld [vmem:[%s2293_s20 + $0x1d0] sm:$0xff]  ;;  %996 = sbr.rel (!%p993_p5) target bundleno = 456 (0x1c8), region = 284 }
 0x1e5   : >> { %1113 = vst [vmem:[%s2289_s7 + $0x1c0] sm:$0xff] %v1112_v59  ;;  %v1118_v62 = vld [vmem:[%s2293_s20 + $0x1d8] sm:$0xff]  ;;  %1115 = vst [vmem:[%s2289_s7 + $0x1c8] sm:$0xff] %v1114_v60  ;;  %v1120_v63 = vld [vmem:[%s2293_s20 + $0x1e0] sm:$0xff] }
 0x1e6   : >> { %1117 = vst [vmem:[%s2289_s7 + $0x1d0] sm:$0xff] %v1116_v61  ;;  %1119 = vst [vmem:[%s2289_s7 + $0x1d8] sm:$0xff] %v1118_v62  ;;  %v1122_v0 = vld [vmem:[%s2293_s20 + $0x1e8] sm:$0xff]  ;;  %v1124_v1 = vld [vmem:[%s2293_s20 + $0x1f0] sm:$0xff] }
 0x1e7   : >> { %1121 = vst [vmem:[%s2289_s7 + $0x1e0] sm:$0xff] %v1120_v63  ;;  %1123 = vst [vmem:[%s2289_s7 + $0x1e8] sm:$0xff] %v1122_v0  ;;  %v1126_v2 = vld [vmem:[%s2293_s20 + $0x1f8] sm:$0xff]  ;;  %s3380_s20 = smov %s3019_s10 }
 0x1e8   : >> { %1125 = vst [vmem:[%s2289_s7 + $0x1f0] sm:$0xff] %v1124_v1  ;;  %1127 = vst [vmem:[%s2289_s7 + $0x1f8] sm:$0xff] %v1126_v2  ;;  %s3379_s7 = smov %s3022_s8 }
 0x1e9 PF: > { %s3128_s22 = sand.u32 63, %s987_s15   ;;  %s1689_s11 = sshll.u32 %s2952_s29, 13 }
 0x1ea   : > { %s1139_s27 = sshra.s32 %s1689_s11, 4  ;;  %p1662_p4 = scmp.le.s32.totalorder %s3128_s22, 0 }
 0x1eb   : > { %s1140_s28 = scalar_lea.vmem %s2926_s18, %s1139_s27 [#allocation5]   ;;  %s1143_s12 = scalar_lea.vmem %s2939_s5, %s1139_s27  }
 0x1ec   : > { %1528 = sbr.rel (%p1662_p4) target bundleno = 505 (0x1f9), region = 289  ;;  %s2303_s25 = smov (!%p1662_p4), %s1143_s12  }
 0x1ed   : > { %s2307_s9 = smov (!%p1662_p4), %s1140_s28   ;;  %s2311_s30 = smov (!%p1662_p4), 0  }
 0x1ee   : > { %s2315_s4 = smov (!%p1662_p4), 0  }
 0x1f1 LB: >> { %v1155_v3 = vld [vmem:[%s2309_s9] sm:$0xff]  ;;  %s1157_s6 = sadd.s32 1, %s2313_s30  ;;  %s1149_s4 = sadd.s32 1, %s2317_s4   ;;  %s2317_s4 = sphi %s2315_s4, %s1149_s4   ;;  %s2313_s30 = sphi %s2311_s30, %s2312_s30   ;;  %s2309_s9 = sphi %s2307_s9, %s1162_s9   ;;  %s2305_s25 = sphi %s2303_s25, %s1163_s25  }
 0x1f2   : >> { %1156 = vst [vmem:[%s2305_s25] sm:$0xff] %v1155_v3  ;;  %p1158_p10 = scmp.ge.s32.totalorder %s1157_s6, %s3128_s22  ;;  %p1148_p11 = scmp.ge.s32.totalorder %s1149_s4, %s3128_s22 }
 0x1f4   : >> { %s3405_s6 = smov (%p1158_p10, %s1157_s6), 0  ;;  %1151 = sbr.rel (!%p1148_p11) target bundleno = 497 (0x1f1), region = 295 }
 0x1f5   : >> { %s1663_s15 = sshll.u32 %s3405_s6, 3  ;;  %s2312_s30 = smov %s3405_s6  }
 0x1f6   : >> { %s1162_s9 = scalar_lea.vmem %s1140_s28, %s1663_s15 [#allocation5]   ;;  %s1163_s25 = scalar_lea.vmem %s1143_s12, %s1663_s15  }
 0x1f9 PF: > { %1166 = sbr.rel (%p983_p2) target bundleno = 569 (0x239), region = 147  ;;  %s3140_s29 = ssub.s32 (!%p983_p2), %s2941_s26, %s2945_s21 }
 0x1fa   : > { %s1172_s7 = sshrl.u32 (!%p983_p2), %s2941_s26, 3  ;;  %s1169_s20 = scalar_lea.vmem (!%p983_p2), %s2926_s18, %s3140_s29 [#allocation5] }
 0x1fb   : > { %s1171_s23 = scalar_lea.vmem (!%p983_p2), %s2939_s5, %s3140_s29  ;;  %s3149_s24 = sshrl.u32 (!%p983_p2), %s1172_s7, 6 }
 0x1fc   : > { %p1665_p12 = scmp.le.s32.totalorder (!%p983_p2), %s3149_s24, 0 }
 0x1fe   : > { %1542 = sbr.rel (%p1665_p12) target bundleno = 548 (0x224), region = 300  ;;  %s3382_s17 = smov (!%p1665_p12), %s2939_s5 }
 0x1ff   : > { %s3383_s14 = smov (!%p1665_p12), %s2926_s18  ;;  %s3158_s10 = smov (!%p1665_p12), 0  }
 0x200   : > { %s3160_s8 = smov (!%p1665_p12), 0  }
 0x203 LB: >> { %v1185_v4 = vld [vmem:[%s2325_s14] sm:$0xff]  ;;  %v1187_v5 = vld [vmem:[%s2325_s14 + $0x8] sm:$0xff]  ;;  %v1189_v6 = vld [vmem:[%s2325_s14 + $0x10] sm:$0xff]  ;;  %s1313_s22 = sadd.s32 1, %s2329_s10  ;;  %s1179_s8 = sadd.s32 1, %s2333_s8   ;;  %s2333_s8 = sphi %s3160_s8, %s1179_s8   ;;  %s2329_s10 = sphi %s3158_s10, %s3386_s10   ;;  %s2325_s14 = sphi %s3383_s14, %s3385_s14   ;;  %s2321_s17 = sphi %s3382_s17, %s3384_s17  }
 0x204   : >> { %1186 = vst [vmem:[%s2321_s17] sm:$0xff] %v1185_v4  ;;  %1188 = vst [vmem:[%s2321_s17 + $0x8] sm:$0xff] %v1187_v5  ;;  %v1191_v7 = vld [vmem:[%s2325_s14 + $0x18] sm:$0xff]  ;;  %v1193_v8 = vld [vmem:[%s2325_s14 + $0x20] sm:$0xff]  ;;  %p1314_p13 = scmp.ge.s32.totalorder %s1313_s22, %s3149_s24  ;;  %p1178_p8 = scmp.ge.s32.totalorder %s1179_s8, %s3149_s24 }
 0x205   : >> { %1190 = vst [vmem:[%s2321_s17 + $0x10] sm:$0xff] %v1189_v6  ;;  %v1195_v9 = vld [vmem:[%s2325_s14 + $0x28] sm:$0xff]  ;;  %1192 = vst [vmem:[%s2321_s17 + $0x18] sm:$0xff] %v1191_v7  ;;  %v1197_v10 = vld [vmem:[%s2325_s14 + $0x30] sm:$0xff] }
 0x206   : >> { %1194 = vst [vmem:[%s2321_s17 + $0x20] sm:$0xff] %v1193_v8  ;;  %1196 = vst [vmem:[%s2321_s17 + $0x28] sm:$0xff] %v1195_v9  ;;  %v1199_v11 = vld [vmem:[%s2325_s14 + $0x38] sm:$0xff]  ;;  %v1201_v12 = vld [vmem:[%s2325_s14 + $0x40] sm:$0xff]  ;;  %s3407_s22 = smov (%p1314_p13, %s1313_s22), 0 }
 0x207   : >> { %1198 = vst [vmem:[%s2321_s17 + $0x30] sm:$0xff] %v1197_v10  ;;  %1200 = vst [vmem:[%s2321_s17 + $0x38] sm:$0xff] %v1199_v11  ;;  %v1203_v13 = vld [vmem:[%s2325_s14 + $0x48] sm:$0xff]  ;;  %v1205_v14 = vld [vmem:[%s2325_s14 + $0x50] sm:$0xff]  ;;  %s1666_s11 = sshll.u32 %s3407_s22, 9  ;;  %s3386_s10 = smov %s3407_s22 }
 0x208   : >> { %1202 = vst [vmem:[%s2321_s17 + $0x40] sm:$0xff] %v1201_v12  ;;  %v1207_v15 = vld [vmem:[%s2325_s14 + $0x58] sm:$0xff]  ;;  %1204 = vst [vmem:[%s2321_s17 + $0x48] sm:$0xff] %v1203_v13  ;;  %v1209_v16 = vld [vmem:[%s2325_s14 + $0x60] sm:$0xff]  ;;  %s3216_s27 = scalar_lea.vmem %s2926_s18, %s1666_s11 [#allocation5]   ;;  %s3219_s28 = scalar_lea.vmem %s2939_s5, %s1666_s11  }
 0x209   : >> { %1206 = vst [vmem:[%s2321_s17 + $0x50] sm:$0xff] %v1205_v14  ;;  %1208 = vst [vmem:[%s2321_s17 + $0x58] sm:$0xff] %v1207_v15  ;;  %v1211_v17 = vld [vmem:[%s2325_s14 + $0x68] sm:$0xff]  ;;  %v1213_v18 = vld [vmem:[%s2325_s14 + $0x70] sm:$0xff] }
 0x20a   : >> { %1210 = vst [vmem:[%s2321_s17 + $0x60] sm:$0xff] %v1209_v16  ;;  %1212 = vst [vmem:[%s2321_s17 + $0x68] sm:$0xff] %v1211_v17  ;;  %v1215_v19 = vld [vmem:[%s2325_s14 + $0x78] sm:$0xff]  ;;  %v1217_v20 = vld [vmem:[%s2325_s14 + $0x80] sm:$0xff] }
 0x20b   : >> { %1214 = vst [vmem:[%s2321_s17 + $0x70] sm:$0xff] %v1213_v18  ;;  %v1219_v21 = vld [vmem:[%s2325_s14 + $0x88] sm:$0xff]  ;;  %1216 = vst [vmem:[%s2321_s17 + $0x78] sm:$0xff] %v1215_v19  ;;  %v1221_v22 = vld [vmem:[%s2325_s14 + $0x90] sm:$0xff] }
 0x20c   : >> { %1218 = vst [vmem:[%s2321_s17 + $0x80] sm:$0xff] %v1217_v20  ;;  %1220 = vst [vmem:[%s2321_s17 + $0x88] sm:$0xff] %v1219_v21  ;;  %v1223_v23 = vld [vmem:[%s2325_s14 + $0x98] sm:$0xff]  ;;  %v1225_v24 = vld [vmem:[%s2325_s14 + $0xa0] sm:$0xff] }
 0x20d   : >> { %1222 = vst [vmem:[%s2321_s17 + $0x90] sm:$0xff] %v1221_v22  ;;  %1224 = vst [vmem:[%s2321_s17 + $0x98] sm:$0xff] %v1223_v23  ;;  %v1227_v25 = vld [vmem:[%s2325_s14 + $0xa8] sm:$0xff]  ;;  %v1229_v26 = vld [vmem:[%s2325_s14 + $0xb0] sm:$0xff] }
 0x20e   : >> { %1226 = vst [vmem:[%s2321_s17 + $0xa0] sm:$0xff] %v1225_v24  ;;  %v1231_v27 = vld [vmem:[%s2325_s14 + $0xb8] sm:$0xff]  ;;  %1228 = vst [vmem:[%s2321_s17 + $0xa8] sm:$0xff] %v1227_v25  ;;  %v1233_v28 = vld [vmem:[%s2325_s14 + $0xc0] sm:$0xff] }
 0x20f   : >> { %1230 = vst [vmem:[%s2321_s17 + $0xb0] sm:$0xff] %v1229_v26  ;;  %1232 = vst [vmem:[%s2321_s17 + $0xb8] sm:$0xff] %v1231_v27  ;;  %v1235_v29 = vld [vmem:[%s2325_s14 + $0xc8] sm:$0xff]  ;;  %v1237_v30 = vld [vmem:[%s2325_s14 + $0xd0] sm:$0xff] }
 0x210   : >> { %1234 = vst [vmem:[%s2321_s17 + $0xc0] sm:$0xff] %v1233_v28  ;;  %1236 = vst [vmem:[%s2321_s17 + $0xc8] sm:$0xff] %v1235_v29  ;;  %v1239_v31 = vld [vmem:[%s2325_s14 + $0xd8] sm:$0xff]  ;;  %v1241_v32 = vld [vmem:[%s2325_s14 + $0xe0] sm:$0xff] }
 0x211   : >> { %1238 = vst [vmem:[%s2321_s17 + $0xd0] sm:$0xff] %v1237_v30  ;;  %v1243_v33 = vld [vmem:[%s2325_s14 + $0xe8] sm:$0xff]  ;;  %1240 = vst [vmem:[%s2321_s17 + $0xd8] sm:$0xff] %v1239_v31  ;;  %v1245_v34 = vld [vmem:[%s2325_s14 + $0xf0] sm:$0xff] }
 0x212   : >> { %1242 = vst [vmem:[%s2321_s17 + $0xe0] sm:$0xff] %v1241_v32  ;;  %1244 = vst [vmem:[%s2321_s17 + $0xe8] sm:$0xff] %v1243_v33  ;;  %v1247_v35 = vld [vmem:[%s2325_s14 + $0xf8] sm:$0xff]  ;;  %v1249_v36 = vld [vmem:[%s2325_s14 + $0x100] sm:$0xff] }
 0x213   : >> { %1246 = vst [vmem:[%s2321_s17 + $0xf0] sm:$0xff] %v1245_v34  ;;  %1248 = vst [vmem:[%s2321_s17 + $0xf8] sm:$0xff] %v1247_v35  ;;  %v1251_v37 = vld [vmem:[%s2325_s14 + $0x108] sm:$0xff]  ;;  %v1253_v38 = vld [vmem:[%s2325_s14 + $0x110] sm:$0xff] }
 0x214   : >> { %1250 = vst [vmem:[%s2321_s17 + $0x100] sm:$0xff] %v1249_v36  ;;  %v1255_v39 = vld [vmem:[%s2325_s14 + $0x118] sm:$0xff]  ;;  %1252 = vst [vmem:[%s2321_s17 + $0x108] sm:$0xff] %v1251_v37  ;;  %v1257_v40 = vld [vmem:[%s2325_s14 + $0x120] sm:$0xff] }
 0x215   : >> { %1254 = vst [vmem:[%s2321_s17 + $0x110] sm:$0xff] %v1253_v38  ;;  %1256 = vst [vmem:[%s2321_s17 + $0x118] sm:$0xff] %v1255_v39  ;;  %v1259_v41 = vld [vmem:[%s2325_s14 + $0x128] sm:$0xff]  ;;  %v1261_v42 = vld [vmem:[%s2325_s14 + $0x130] sm:$0xff] }
 0x216   : >> { %1258 = vst [vmem:[%s2321_s17 + $0x120] sm:$0xff] %v1257_v40  ;;  %1260 = vst [vmem:[%s2321_s17 + $0x128] sm:$0xff] %v1259_v41  ;;  %v1263_v43 = vld [vmem:[%s2325_s14 + $0x138] sm:$0xff]  ;;  %v1265_v44 = vld [vmem:[%s2325_s14 + $0x140] sm:$0xff] }
 0x217   : >> { %1262 = vst [vmem:[%s2321_s17 + $0x130] sm:$0xff] %v1261_v42  ;;  %v1267_v45 = vld [vmem:[%s2325_s14 + $0x148] sm:$0xff]  ;;  %1264 = vst [vmem:[%s2321_s17 + $0x138] sm:$0xff] %v1263_v43  ;;  %v1269_v46 = vld [vmem:[%s2325_s14 + $0x150] sm:$0xff] }
 0x218   : >> { %1266 = vst [vmem:[%s2321_s17 + $0x140] sm:$0xff] %v1265_v44  ;;  %1268 = vst [vmem:[%s2321_s17 + $0x148] sm:$0xff] %v1267_v45  ;;  %v1271_v47 = vld [vmem:[%s2325_s14 + $0x158] sm:$0xff]  ;;  %v1273_v48 = vld [vmem:[%s2325_s14 + $0x160] sm:$0xff] }
 0x219   : >> { %1270 = vst [vmem:[%s2321_s17 + $0x150] sm:$0xff] %v1269_v46  ;;  %1272 = vst [vmem:[%s2321_s17 + $0x158] sm:$0xff] %v1271_v47  ;;  %v1275_v49 = vld [vmem:[%s2325_s14 + $0x168] sm:$0xff]  ;;  %v1277_v50 = vld [vmem:[%s2325_s14 + $0x170] sm:$0xff] }
 0x21a   : >> { %1274 = vst [vmem:[%s2321_s17 + $0x160] sm:$0xff] %v1273_v48  ;;  %v1279_v51 = vld [vmem:[%s2325_s14 + $0x178] sm:$0xff]  ;;  %1276 = vst [vmem:[%s2321_s17 + $0x168] sm:$0xff] %v1275_v49  ;;  %v1281_v52 = vld [vmem:[%s2325_s14 + $0x180] sm:$0xff] }
 0x21b   : >> { %1278 = vst [vmem:[%s2321_s17 + $0x170] sm:$0xff] %v1277_v50  ;;  %1280 = vst [vmem:[%s2321_s17 + $0x178] sm:$0xff] %v1279_v51  ;;  %v1283_v53 = vld [vmem:[%s2325_s14 + $0x188] sm:$0xff]  ;;  %v1285_v54 = vld [vmem:[%s2325_s14 + $0x190] sm:$0xff] }
 0x21c   : >> { %1282 = vst [vmem:[%s2321_s17 + $0x180] sm:$0xff] %v1281_v52  ;;  %1284 = vst [vmem:[%s2321_s17 + $0x188] sm:$0xff] %v1283_v53  ;;  %v1287_v55 = vld [vmem:[%s2325_s14 + $0x198] sm:$0xff]  ;;  %v1289_v56 = vld [vmem:[%s2325_s14 + $0x1a0] sm:$0xff] }
 0x21d   : >> { %1286 = vst [vmem:[%s2321_s17 + $0x190] sm:$0xff] %v1285_v54  ;;  %v1291_v57 = vld [vmem:[%s2325_s14 + $0x1a8] sm:$0xff]  ;;  %1288 = vst [vmem:[%s2321_s17 + $0x198] sm:$0xff] %v1287_v55  ;;  %v1293_v58 = vld [vmem:[%s2325_s14 + $0x1b0] sm:$0xff] }
 0x21e   : >> { %1290 = vst [vmem:[%s2321_s17 + $0x1a0] sm:$0xff] %v1289_v56  ;;  %1292 = vst [vmem:[%s2321_s17 + $0x1a8] sm:$0xff] %v1291_v57  ;;  %v1295_v59 = vld [vmem:[%s2325_s14 + $0x1b8] sm:$0xff]  ;;  %v1297_v60 = vld [vmem:[%s2325_s14 + $0x1c0] sm:$0xff] }
 0x21f   : >> { %1294 = vst [vmem:[%s2321_s17 + $0x1b0] sm:$0xff] %v1293_v58  ;;  %1296 = vst [vmem:[%s2321_s17 + $0x1b8] sm:$0xff] %v1295_v59  ;;  %v1299_v61 = vld [vmem:[%s2325_s14 + $0x1c8] sm:$0xff]  ;;  %v1301_v62 = vld [vmem:[%s2325_s14 + $0x1d0] sm:$0xff]  ;;  %1181 = sbr.rel (!%p1178_p8) target bundleno = 515 (0x203), region = 306 }
 0x220   : >> { %1298 = vst [vmem:[%s2321_s17 + $0x1c0] sm:$0xff] %v1297_v60  ;;  %v1303_v63 = vld [vmem:[%s2325_s14 + $0x1d8] sm:$0xff]  ;;  %1300 = vst [vmem:[%s2321_s17 + $0x1c8] sm:$0xff] %v1299_v61  ;;  %v1305_v0 = vld [vmem:[%s2325_s14 + $0x1e0] sm:$0xff] }
 0x221   : >> { %1302 = vst [vmem:[%s2321_s17 + $0x1d0] sm:$0xff] %v1301_v62  ;;  %1304 = vst [vmem:[%s2321_s17 + $0x1d8] sm:$0xff] %v1303_v63  ;;  %v1307_v1 = vld [vmem:[%s2325_s14 + $0x1e8] sm:$0xff]  ;;  %v1309_v2 = vld [vmem:[%s2325_s14 + $0x1f0] sm:$0xff] }
 0x222   : >> { %1306 = vst [vmem:[%s2321_s17 + $0x1e0] sm:$0xff] %v1305_v0  ;;  %1308 = vst [vmem:[%s2321_s17 + $0x1e8] sm:$0xff] %v1307_v1  ;;  %v1311_v3 = vld [vmem:[%s2325_s14 + $0x1f8] sm:$0xff]  ;;  %s3385_s14 = smov %s3216_s27 }
 0x223   : >> { %1310 = vst [vmem:[%s2321_s17 + $0x1f0] sm:$0xff] %v1309_v2  ;;  %1312 = vst [vmem:[%s2321_s17 + $0x1f8] sm:$0xff] %v1311_v3  ;;  %s3384_s17 = smov %s3219_s28 }
 0x224 PF: > { %s3325_s12 = sand.u32 63, %s1172_s7   ;;  %s1691_s25 = sshll.u32 %s3149_s24, 13 }
 0x225   : > { %s1324_s9 = sshra.s32 %s1691_s25, 4  ;;  %p1671_p9 = scmp.le.s32.totalorder %s3325_s12, 0 }
 0x226   : > { %s1325_s30 = scalar_lea.vmem %s2926_s18, %s1324_s9 [#allocation5]   ;;  %s1328_s4 = scalar_lea.vmem %s2939_s5, %s1324_s9  }
 0x227   : > { %1556 = sbr.rel (%p1671_p9) target bundleno = 564 (0x234), region = 311  ;;  %s2335_s6 = smov (!%p1671_p9), %s1328_s4  }
 0x228   : > { %s2339_s15 = smov (!%p1671_p9), %s1325_s30   ;;  %s2343_s22 = smov (!%p1671_p9), 0  }
 0x229   : > { %s2347_s8 = smov (!%p1671_p9), 0  }
 0x22c LB: >> { %v1340_v4 = vld [vmem:[%s2341_s15] sm:$0xff]  ;;  %s1342_s7 = sadd.s32 1, %s2345_s22  ;;  %s1334_s8 = sadd.s32 1, %s2349_s8   ;;  %s2349_s8 = sphi %s2347_s8, %s1334_s8   ;;  %s2345_s22 = sphi %s2343_s22, %s2344_s22   ;;  %s2341_s15 = sphi %s2339_s15, %s1347_s15   ;;  %s2337_s6 = sphi %s2335_s6, %s1348_s6  }
 0x22d   : >> { %1341 = vst [vmem:[%s2337_s6] sm:$0xff] %v1340_v4  ;;  %p1343_p0 = scmp.ge.s32.totalorder %s1342_s7, %s3325_s12  ;;  %p1333_p1 = scmp.ge.s32.totalorder %s1334_s8, %s3325_s12 }
 0x22f   : >> { %s3409_s7 = smov (%p1343_p0, %s1342_s7), 0  ;;  %1336 = sbr.rel (!%p1333_p1) target bundleno = 556 (0x22c), region = 317 }
 0x230   : >> { %s1672_s24 = sshll.u32 %s3409_s7, 3  ;;  %s2344_s22 = smov %s3409_s7  }
 0x231   : >> { %s1347_s15 = scalar_lea.vmem %s1325_s30, %s1672_s24 [#allocation5]   ;;  %s1348_s6 = scalar_lea.vmem %s1328_s4, %s1672_s24  }
 0x234 PF: > { %s2358_s17 = smov 1  }
 0x235   : > { %s1349_s14 = sshll.u32 %s2358_s17, %s2945_s21 }
 0x236   : > { %s1674_s10 = sadd.s32 4294967295, %s1349_s14 }
 0x237   : > { %v1359_v5 = vld [vmem:[%s1169_s20] sm:%s1674_s10] }
 0x238   : > { %1360 = vst [vmem:[%s1171_s23] sm:%s1674_s10] %v1359_v5 }
 0x239 PF: > { %p1675_p2 = scmp.ge.u32.totalorder %s2941_s26, 8 }
 0x23a   : > { %s2359_s11 = smov (!%p1675_p2), 1  }
 0x23b   : > { %969 = sbr.rel (%p1675_p2) target bundleno = 578 (0x242), region = 118  ;;  %s970_s27 = sshll.u32 (!%p1675_p2), %s2359_s11, %s2941_s26 }
 0x23c   : > { %s1676_s28 = sadd.s32 (!%p1675_p2), 4294967295, %s970_s27 }
 0x240   : > { %v980_v6 = vld [vmem:[%s2926_s18] sm:%s1676_s28] }
 0x241   : > { %981 = vst [vmem:[%s2939_s5] sm:%s1676_s28] %v980_v6 }
 0x242 PF: > { %p11_p3 = scmp.ge.s32.totalorder %s2399_s16, 4   ;;  %s3387_s12 = smov %s2217_s13 }
 0x243   : > { %s3388_s13 = smov %s2409_s19  ;;  %s3389_s14 = smov %s2399_s16 }
 0x244   :  { %13 = sbr.rel (!%p11_p3) target bundleno = 2 (0x2), region = 328 }
 0x249   :  { %1374 = vsyncpa [#allocation3], 1 }
 0x24a   :  { %1376 = vsyncpa [#allocation3 + $0x1], 1 }

// kernel: lenet_forward.4
= control target key start
LH: loop header
LB: loop body
LE: loop exit
PB: predicated region body
PF: predicated region fallthrough
CT: control target
= control target key end

     0   :  { %s674_s12 = smov 0   ;;  %s676_s13 = smov 0   ;;  %s792_s0 = inlined_call_operand.vmem [shape: bf16[16,150], index: 0, kind: input, shape index: {}]   ;;  %s793_s1 = inlined_call_operand.vmem [shape: f32[16,1], index: 1, kind: input, shape index: {}]   ;;  %s794_s2 = inlined_call_operand.vmem [shape: bf16[150,200], index: 2, kind: input, shape index: {}]   ;;  %s795_s3 = inlined_call_operand.vmem [shape: bf16[16,200], index: 3, kind: output, shape index: {}]  }
   0x1   :  { %s678_s14 = smov 0  }
   0x2 LB: > { %s551_s15 = sadd.s32 4294967295, %s651_s14   ;;  %s691_s16 = sadd.s32 1, %s651_s14   ;;  %s651_s14 = sphi %s678_s14, %s799_s14   ;;  %s647_s13 = sphi %s676_s13, %s798_s13   ;;  %s643_s12 = sphi %s674_s12, %s797_s12  }
   0x3   : > { %s59_s17 = ssub.s32 %s651_s14, %s691_s16  ;;  %s62_s18 = sadd.s32 1, %s647_s13 }
   0x4   : > { %p60_p0 = scmp.eq.s32.totalorder %s59_s17, 0  ;;  %p69_p1 = scmp.ne.s32.totalorder %s647_s13, %s643_s12 }
   0x5   : > { %p70_p2 = scmp.eq.s32.totalorder %s651_s14, 0  ;;  %p99_p3 = scmp.eq.s32.totalorder %s551_s15, 1 }
   0x6   : > { %s702_s19 = scalar_select %p60_p0, %s647_s13, %s62_s18  }
   0x7   : > { %p71_p4 = por %p70_p2, %p69_p1  ;;  %p704_p5 = por %p99_p3, %p69_p1 }
   0x8   : > { %p554_p6 = scmp.ge.s32.totalorder %s651_s14, 2 }
   0xa   : > { %127 = sbr.rel (%p554_p6) target bundleno = 32 (0x20), region = 24 }
   0xf   : > { %130 = sbr.rel (!%p71_p4) target bundleno = 32 (0x20), region = 28  ;;  %s132_s21 = sand.u32 (%p71_p4), 1, %s647_s13  }
  0x10   : > { %s555_s22 = sshll.u32 (%p71_p4), %s651_s14, 2  ;;  %s584_s23 = smul.u32 (%p71_p4), 76, %s132_s21 }
  0x11   : > { %s714_s26 = scalar_lea.vmem (%p71_p4), %s794_s2, %s555_s22 }
  0x12   : > { %v153_v0 = vld [vmem:[%s714_s26] sm:$0xf] (%p71_p4)  ;;  %v155_v1 = vld [vmem:[%s714_s26 + $0x8] sm:$0xf] (%p71_p4)  ;;  %v157_v2 = vld [vmem:[%s714_s26 + $0x10] sm:$0xf] (%p71_p4) }
  0x13   : > { %v159_v3 = vld [vmem:[%s714_s26 + $0x18] sm:$0xf] (%p71_p4)  ;;  %v161_v4 = vld [vmem:[%s714_s26 + $0x20] sm:$0xf] (%p71_p4)  ;;  %s721_s27 = scalar_lea.vmem (%p71_p4), [#allocation2], %s584_s23 }
  0x14   : > { %154 = vst [vmem:[%s721_s27] sm:$0xf] %v153_v0  ;;  %156 = vst [vmem:[%s721_s27 + $0x4] sm:$0xf] %v155_v1  ;;  %v163_v5 = vld [vmem:[%s714_s26 + $0x28] sm:$0xf] }
  0x15   : > { %158 = vst [vmem:[%s721_s27 + $0x8] sm:$0xf] %v157_v2  ;;  %160 = vst [vmem:[%s721_s27 + $0xc] sm:$0xf] %v159_v3  ;;  %v165_v6 = vld [vmem:[%s714_s26 + $0x30] sm:$0xf] }
  0x16   : > { %162 = vst [vmem:[%s721_s27 + $0x10] sm:$0xf] %v161_v4  ;;  %v167_v7 = vld [vmem:[%s714_s26 + $0x38] sm:$0xf]  ;;  %164 = vst [vmem:[%s721_s27 + $0x14] sm:$0xf] %v163_v5 }
  0x17   : > { %166 = vst [vmem:[%s721_s27 + $0x18] sm:$0xf] %v165_v6  ;;  %168 = vst [vmem:[%s721_s27 + $0x1c] sm:$0xf] %v167_v7  ;;  %v169_v8 = vld [vmem:[%s714_s26 + $0x40] sm:$0xf] }
  0x18   : > { %v171_v9 = vld [vmem:[%s714_s26 + $0x48] sm:$0xf]  ;;  %v173_v10 = vld [vmem:[%s714_s26 + $0x50] sm:$0xf]  ;;  %170 = vst [vmem:[%s721_s27 + $0x20] sm:$0xf] %v169_v8 }
  0x19   : > { %172 = vst [vmem:[%s721_s27 + $0x24] sm:$0xf] %v171_v9  ;;  %174 = vst [vmem:[%s721_s27 + $0x28] sm:$0xf] %v173_v10  ;;  %v175_v11 = vld [vmem:[%s714_s26 + $0x58] sm:$0xf] }
  0x1a   : > { %v177_v12 = vld [vmem:[%s714_s26 + $0x60] sm:$0xf]  ;;  %v179_v13 = vld [vmem:[%s714_s26 + $0x68] sm:$0xf]  ;;  %176 = vst [vmem:[%s721_s27 + $0x2c] sm:$0xf] %v175_v11 }
  0x1b   : > { %178 = vst [vmem:[%s721_s27 + $0x30] sm:$0xf] %v177_v12  ;;  %180 = vst [vmem:[%s721_s27 + $0x34] sm:$0xf] %v179_v13  ;;  %v181_v14 = vld [vmem:[%s714_s26 + $0x70] sm:$0xf] }
  0x1c   : > { %v183_v15 = vld [vmem:[%s714_s26 + $0x78] sm:$0xf]  ;;  %v185_v16 = vld [vmem:[%s714_s26 + $0x80] sm:$0xf]  ;;  %182 = vst [vmem:[%s721_s27 + $0x38] sm:$0xf] %v181_v14 }
  0x1d   : > { %184 = vst [vmem:[%s721_s27 + $0x3c] sm:$0xf] %v183_v15  ;;  %186 = vst [vmem:[%s721_s27 + $0x40] sm:$0xf] %v185_v16  ;;  %v187_v17 = vld [vmem:[%s714_s26 + $0x88] sm:$0xf] }
  0x1e   : > { %v189_v18 = vld [vmem:[%s714_s26 + $0x90] sm:$0xf]  ;;  %188 = vst [vmem:[%s721_s27 + $0x44] sm:$0xf] %v187_v17 }
  0x1f   : > { %190 = vst [vmem:[%s721_s27 + $0x48] sm:$0xf] %v189_v18 }
  0x20 PF: > { %p556_p7 = scmp.ge.s32.totalorder %s651_s14, 1  ;;  %p251_p8 = scmp.lt.s32.totalorder %s651_s14, 3 }
  0x22   : > { %p252_p9 = pnand %p556_p7, %p251_p8 }
  0x23   : > { %s258_s28 = sand.u32 (!%p252_p9), 1, %s643_s12  }
  0x24   : > { %255 = sbr.rel (%p252_p9) target bundleno = 307 (0x133), region = 69  ;;  %s557_s17 = sshll.u32 (!%p252_p9), %s258_s28, 3 }
  0x25   : > { %s585_s29 = smul.u32 (!%p252_p9), 76, %s258_s28  ;;  %s279_s18 = scalar_lea.vmem (!%p252_p9), [#allocation3], %s557_s17 }
  0x27   : > { %s260_s9 = scalar_lea.vmem (!%p252_p9), [#allocation2], %s585_s29 }
  0x29   : > { %vm380_vm0 = vcmask 179200   ;;  %v653_v19 = vmov 0   ;;  %v624_v20 = vld [vmem:[%s792_s0 + $0x4] ss:$8 sps:$4 sm:$0xff]   ;;  %v613_v24 = vld [vmem:[%s260_s9 + $0x30] sm:$0xff]   ;;  %vm384_vm1 = vcmask 1042432  }
  0x2a   : > { %388 = vmatprep.subr.bf16.mxu0 %v653_v19  ;;  %611 = vset.pattern.permute.xlu0 %v653_v19  ;;  %v302_v21 = vld [vmem:[%s793_s1] sm:$0xff]  ;;  %v303_v22 = vld [vmem:[%s793_s1 + $0x8] sm:$0xff]  ;;  %s574_s21 = sshll.u32 (%p704_p5), %s551_s15, 2 }
  0x2b   : > { %306 = vperm.xlu0 %611, %v302_v21   ;;  %570 = vmatprep.mubr.msk.bf16.mxu0 %vm380_vm0, %v624_v20  ;;  %v612_v23 = vld [vmem:[%s260_s9 + $0x38] sm:$0xff]   ;;  %v614_v25 = vld [vmem:[%s260_s9 + $0x28] sm:$0xff]   ;;  %v615_v26 = vld [vmem:[%s260_s9 + $0x20] sm:$0xff]   ;;  %s449_s24 = scalar_lea.vmem (%p704_p5), %s795_s3, %s574_s21 }
  0x2c   : > { %389 = vmatpush1.bf16.msra.mxu0 %v612_v23  ;;  %v616_v27 = vld [vmem:[%s260_s9 + $0x18] sm:$0xff]   ;;  %v617_v28 = vld [vmem:[%s260_s9 + $0x10] sm:$0xff]   ;;  %v618_v29 = vld [vmem:[%s260_s9 + $0x8] sm:$0xff]  }
  0x2d   : > { %390 = vmatprep.subr.bf16.mxu0 %v653_v19  ;;  %v619_v30 = vld [vmem:[%s260_s9] sm:$0xff]   ;;  %v620_v31 = vld [vmem:[%s260_s9 + $0x48] ss:$0 sps:$4 sm:$0x77]  }
  0x2e   : > { %v386_v32 = vsel %vm384_vm1, %v620_v31, 0  ;;  %v621_v33 = vld [vmem:[%s260_s9 + $0x40] sm:$0xff]  }
  0x2f   : > { %311 = vperm.xlu0 %611, %v303_v22   ;;  %v622_v34 = vld [vmem:[%s792_s0] ss:$8 sps:$4 sm:$0xff]  }
  0x30   : > { %391 = vmatpush1.bf16.msra.mxu0 %v613_v24 }
  0x31   : > { %392 = vmatprep.subr.bf16.mxu0 %v653_v19 }
  0x34   : > { %393 = vmatpush1.bf16.msra.mxu0 %v614_v25 }
  0x35   : > { %394 = vmatprep.subr.bf16.mxu0 %v653_v19 }
  0x38   : > { %395 = vmatpush1.bf16.msra.mxu0 %v615_v26 }
  0x39   : > { %396 = vmatprep.subr.bf16.mxu0 %v653_v19 }
  0x3c   : > { %397 = vmatpush1.bf16.msra.mxu0 %v616_v27 }
  0x3d   : > { %398 = vmatprep.subr.bf16.mxu0 %v653_v19 }
  0x40   : > { %399 = vmatpush1.bf16.msra.mxu0 %v617_v28 }
  0x41   : > { %400 = vmatprep.subr.bf16.mxu0 %v653_v19 }
  0x44   : > { %401 = vmatpush1.bf16.msra.mxu0 %v618_v29 }
  0x45   : > { %402 = vmatprep.subr.bf16.mxu0 %v653_v19 }
  0x48   : > { %403 = vmatpush1.bf16.msra.mxu0 %v619_v30 }
  0x49   : > { %416 = vmatprep.subr.bf16.mxu0 %v653_v19 }
  0x4c   : > { %417 = vmatpush2.bf16.msra.mxu0 %v386_v32 }
  0x4d   : > { %418 = vmatprep.subr.bf16.mxu0 %v653_v19 }
  0x50   : > { %419 = vmatpush2.bf16.msra.mxu0 %v621_v33 }
  0x53   : > { %421 = vmatmul.mubr.bf16.vlgmr.msra.gmra.mxu0 %v622_v34 }
  0xa6   : > { %v307_v35 = vpop.permute.xlu0 %306 }
  0xaa   : > { %v312_v39 = vpop.permute.xlu0 %311 }
 0x113   : > { %v422_v36 = vpop.f32.mrf.mxu0 }
 0x114   : > { %v423_v37 = vadd.f32 %v422_v36, %v307_v35 }
 0x115   : > { %v424_v38 = vpop.f32.mrf.mxu0 }
 0x116   : > { %625 = vtanh.f32 %v423_v37 }
 0x117   : > { %v425_v40 = vpop.f32.mrf.mxu0 }
 0x118   : > { %v426_v41 = vadd.f32 %v425_v40, %v312_v39 }
 0x119   : > { %v427_v42 = vpop.f32.mrf.mxu0 }
 0x11a   : > { %627 = vtanh.f32 %v426_v41 }
 0x123   : > { %v626_v43 = vpop.eup %625 }
 0x126   : > { %447 = sbr.rel (!%p704_p5) target bundleno = 307 (0x133), region = 77 }
 0x127   : > { %v628_v44 = vpop.eup %627 }
 0x128   : > { %v582_v45 = vpack.c.bf16 %v628_v44, %v626_v43 }
 0x12a   : > { %583 = vst [vmem:[%s279_s18] sm:$0xff] %v582_v45  }
 0x131   : > { %v466_v46 = vld [vmem:[%s279_s18] sm:$0xf]  ;;  %v468_v47 = vld [vmem:[%s279_s18 + $0x4] sm:$0xf] }
 0x132   : > { %467 = vst [vmem:[%s449_s24] sm:$0xf] %v466_v46  ;;  %469 = vst [vmem:[%s449_s24 + $0x8] sm:$0xf] %v468_v47 }
 0x133 PF: > { %p10_p10 = scmp.ge.s32.totalorder %s691_s16, 4   ;;  %s797_s12 = smov %s647_s13 }
 0x134   : > { %s798_s13 = smov %s702_s19  ;;  %s799_s14 = smov %s691_s16 }
 0x135   :  { %12 = sbr.rel (!%p10_p10) target bundleno = 2 (0x2), region = 149 }

// kernel: lenet_forward.5
= control target key start
LH: loop header
LB: loop body
LE: loop exit
PB: predicated region body
PF: predicated region fallthrough
CT: control target
= control target key end

     0   :  { %v1311_v0 = vmov 0   ;;  %vm493_vm0 = vcmask 130048   ;;  %vm823_vm1 = vcmask 982016   ;;  %vm842_vm2 = vcmask 1043456   ;;  %s1736_s6 = inlined_call_operand.vmem [shape: bf16[400,2], index: 6, kind: input, shape index: {}]   ;;  %s1737_s0 = inlined_call_operand.vmem [shape: bf16[120,400], index: 0, kind: input, shape index: {}]   ;;  %s1738_s1 = inlined_call_operand.vmem [shape: f32[120,1], index: 1, kind: input, shape index: {}]   ;;  %s1739_s3 = inlined_call_operand.vmem [shape: f32[84,1], index: 3, kind: input, shape index: {}]   ;;  %s1740_s5 = inlined_call_operand.vmem [shape: f32[10,1], index: 5, kind: input, shape index: {}]   ;;  %s1741_s2 = inlined_call_operand.vmem [shape: bf16[84,120], index: 2, kind: input, shape index: {}]   ;;  %s1742_s4 = inlined_call_operand.vmem [shape: bf16[10,84], index: 4, kind: input, shape index: {}]   ;;  %s1743_s7 = inlined_call_operand.vmem [shape: f32[10,2], index: 7, kind: output, shape index: {}]  }
   0x1   :  { %614 = vmatprep.subr.bf16.mxu1 %v1311_v0  ;;  %v1233_v1 = vld [vmem:[%s1736_s6 + $0x78] sm:$0xff]   ;;  %1232 = vset.pattern.permute.xlu1 %v1311_v0  ;;  %v1236_v4 = vld [vmem:[%s1736_s6 + $0x70] sm:$0xff]   ;;  %v1239_v7 = vld [vmem:[%s1736_s6 + $0x68] sm:$0xff]   ;;  %vm1313_vm3 = vmmov 0   ;;  %vm966_vm4 = vcmask 1041408   ;;  %vm962_vm5 = vcmask 687104  }
   0x2   :  { %v1234_v2 = vld [vmem:[%s1736_s6 + $0xb8] sm:$0xff]   ;;  %1231 = vset.pattern.permute.xlu0 %v1311_v0  ;;  %1098 = vmatprep.subr.bf16.mxu0 %v1233_v1  ;;  %v1237_v5 = vld [vmem:[%s1736_s6 + $0xb0] sm:$0xff]   ;;  %v1240_v8 = vld [vmem:[%s1736_s6 + $0xa8] sm:$0xff]   ;;  %vm1011_vm6 = vcmask 15360   ;;  %vm1013_vm7 = vcmask 9216  }
   0x3   :  { %v1235_v3 = vld [vmem:[%s1736_s6 + $0x38] sm:$0xff]   ;;  %615 = vmatpush1.bf16.msra.mxu1 %v1234_v2  ;;  %v1238_v6 = vld [vmem:[%s1736_s6 + $0x30] sm:$0xff]   ;;  %v1241_v9 = vld [vmem:[%s1736_s6 + $0x28] sm:$0xff]  }
   0x4   :  { %1099 = vmatpush3.bf16.msra.mxu0 %v1235_v3  ;;  %616 = vmatprep.subr.bf16.mxu1 %v1311_v0  ;;  %v1242_v10 = vld [vmem:[%s1736_s6 + $0x60] sm:$0xff]   ;;  %v1245_v13 = vld [vmem:[%s1736_s6 + $0x58] sm:$0xff]   ;;  %v1248_v16 = vld [vmem:[%s1736_s6 + $0x50] sm:$0xff]  }
   0x5   :  { %1100 = vmatprep.subr.bf16.mxu0 %v1236_v4  ;;  %v1243_v11 = vld [vmem:[%s1736_s6 + $0xa0] sm:$0xff]   ;;  %v1246_v14 = vld [vmem:[%s1736_s6 + $0x98] sm:$0xff]   ;;  %v1249_v17 = vld [vmem:[%s1736_s6 + $0x90] sm:$0xff]  }
   0x6   :  { %v1244_v12 = vld [vmem:[%s1736_s6 + $0x20] sm:$0xff]   ;;  %v1247_v15 = vld [vmem:[%s1736_s6 + $0x18] sm:$0xff]   ;;  %v1250_v18 = vld [vmem:[%s1736_s6 + $0x10] sm:$0xff]  }
   0x7   :  { %617 = vmatpush1.bf16.msra.mxu1 %v1237_v5  ;;  %v1251_v19 = vld [vmem:[%s1736_s6 + $0x48] sm:$0xff]   ;;  %v1254_v22 = vld [vmem:[%s1736_s6 + $0x40] sm:$0xff]   ;;  %v121_v35 = vld [vmem:[%s1738_s1 + $0x70] sm:$0xff] }
   0x8   :  { %1101 = vmatpush3.bf16.msra.mxu0 %v1238_v6  ;;  %618 = vmatprep.subr.bf16.mxu1 %v1311_v0  ;;  %v1252_v20 = vld [vmem:[%s1736_s6 + $0x88] sm:$0xff]   ;;  %v1259_v23 = vld [vmem:[%s1737_s0 + $0x4] ss:$16 sps:$4 sm:$0xff]   ;;  %v1257_v27 = vld [vmem:[%s1737_s0] ss:$16 sps:$4 sm:$0xff]  }
   0x9   :  { %1102 = vmatprep.subr.bf16.mxu0 %v1239_v7  ;;  %v1253_v21 = vld [vmem:[%s1736_s6 + $0x8] sm:$0xff]   ;;  %v1255_v24 = vld [vmem:[%s1736_s6 + $0x80] sm:$0xff]   ;;  %550 = vmatprep.mubr.bf16.mxu0 %v1259_v23  ;;  %v117_v39 = vld [vmem:[%s1738_s1 + $0x50] sm:$0xff] }
   0xa   :  { %v1263_v25 = vld [vmem:[%s1737_s0 + $0xc] ss:$16 sps:$4 sm:$0xff]   ;;  %v1256_v26 = vld [vmem:[%s1736_s6] sm:$0xff]   ;;  %v1261_v30 = vld [vmem:[%s1737_s0 + $0x8] ss:$16 sps:$4 sm:$0xff]   ;;  %194 = vperm.xlu0 %1231, %v121_v35  }
   0xb   :  { %619 = vmatpush1.bf16.msra.mxu1 %v1240_v8  ;;  %1076 = vmatprep.mubr.msk.bf16.mxu1 %vm493_vm0, %v1263_v25  ;;  %v1260_v28 = vld [vmem:[%s1736_s6 + $0xc0] sm:$0xff]   ;;  %v1267_v31 = vld [vmem:[%s1737_s0 + $0x2c] ss:$16 sps:$4 sm:$0xff]   ;;  %v1269_v34 = vld [vmem:[%s1737_s0 + $0x28] ss:$16 sps:$4 sm:$0xff]  }
   0xc   :  { %1103 = vmatpush3.bf16.msra.mxu0 %v1241_v9  ;;  %620 = vmatprep.subr.bf16.mxu1 %v1311_v0  ;;  %v1264_v29 = vld [vmem:[%s1737_s0 + $0x24] ss:$16 sps:$4 sm:$0xff]   ;;  %v1266_v32 = vld [vmem:[%s1737_s0 + $0x20] ss:$16 sps:$4 sm:$0xff]   ;;  %v120_v36 = vld [vmem:[%s1738_s1 + $0x68] sm:$0xff] }
   0xd   :  { %1104 = vmatprep.subr.bf16.mxu0 %v1242_v10  ;;  %v1270_v33 = vld [vmem:[%s1737_s0 + $0x44] ss:$16 sps:$4 sm:$0xff]   ;;  %v1273_v37 = vld [vmem:[%s1737_s0 + $0x4c] ss:$16 sps:$4 sm:$0xff]   ;;  %189 = vperm.xlu1 %1232, %v120_v36   ;;  %v1272_v40 = vld [vmem:[%s1737_s0 + $0x40] ss:$16 sps:$4 sm:$0xff]  }
   0xe   :  { %v119_v38 = vld [vmem:[%s1738_s1 + $0x60] sm:$0xff]  ;;  %v118_v42 = vld [vmem:[%s1738_s1 + $0x58] sm:$0xff]  ;;  %v116_v46 = vld [vmem:[%s1738_s1 + $0x48] sm:$0xff] }
   0xf   :  { %621 = vmatpush1.bf16.msra.mxu1 %v1243_v11  ;;  %184 = vperm.xlu0 %1231, %v119_v38   ;;  %v1276_v41 = vld [vmem:[%s1737_s0 + $0x64] ss:$16 sps:$4 sm:$0xff]   ;;  %v1275_v44 = vld [vmem:[%s1737_s0 + $0x48] ss:$16 sps:$4 sm:$0xff]   ;;  %v1279_v45 = vld [vmem:[%s1737_s0 + $0x6c] ss:$16 sps:$4 sm:$0xff]  }
  0x10   :  { %1105 = vmatpush3.bf16.msra.mxu0 %v1244_v12  ;;  %622 = vmatprep.subr.bf16.mxu1 %v1311_v0  ;;  %v115_v43 = vld [vmem:[%s1738_s1 + $0x40] sm:$0xff]  ;;  %v113_v47 = vld [vmem:[%s1738_s1 + $0x30] sm:$0xff]  ;;  %v114_v50 = vld [vmem:[%s1738_s1 + $0x38] sm:$0xff] }
  0x11   :  { %1106 = vmatprep.subr.bf16.mxu0 %v1245_v13  ;;  %174 = vperm.xlu1 %1232, %v117_v39   ;;  %v1278_v48 = vld [vmem:[%s1737_s0 + $0x60] ss:$16 sps:$4 sm:$0xff]   ;;  %v1282_v49 = vld [vmem:[%s1737_s0 + $0x84] ss:$16 sps:$4 sm:$0xff]   ;;  %v1281_v52 = vld [vmem:[%s1737_s0 + $0x68] ss:$16 sps:$4 sm:$0xff]  }
  0x12   :  { %v111_v51 = vld [vmem:[%s1738_s1 + $0x20] sm:$0xff]  ;;  %v1285_v53 = vld [vmem:[%s1737_s0 + $0x8c] ss:$16 sps:$4 sm:$0xff]   ;;  %v109_v55 = vld [vmem:[%s1738_s1 + $0x10] sm:$0xff] }
  0x13   :  { %623 = vmatpush1.bf16.msra.mxu1 %v1246_v14  ;;  %179 = vperm.xlu0 %1231, %v118_v42   ;;  %v112_v54 = vld [vmem:[%s1738_s1 + $0x28] sm:$0xff]  ;;  %v1284_v56 = vld [vmem:[%s1737_s0 + $0x80] ss:$16 sps:$4 sm:$0xff]   ;;  %v1288_v57 = vld [vmem:[%s1737_s0 + $0xa4] ss:$16 sps:$4 sm:$0xff]  }
  0x14   :  { %1107 = vmatpush3.bf16.msra.mxu0 %v1247_v15  ;;  %624 = vmatprep.subr.bf16.mxu1 %v1311_v0  ;;  %v110_v58 = vld [vmem:[%s1738_s1 + $0x18] sm:$0xff]  ;;  %v107_v59 = vld [vmem:[%s1738_s1] sm:$0xff]  ;;  %v108_v62 = vld [vmem:[%s1738_s1 + $0x8] sm:$0xff] }
  0x15   :  { %1108 = vmatprep.subr.bf16.mxu0 %v1248_v16  ;;  %164 = vperm.xlu1 %1232, %v115_v43   ;;  %v1287_v60 = vld [vmem:[%s1737_s0 + $0x88] ss:$16 sps:$4 sm:$0xff]   ;;  %v1291_v61 = vld [vmem:[%s1737_s0 + $0xac] ss:$16 sps:$4 sm:$0xff]   ;;  %v739_v63 = vld [vmem:[%s1739_s3 + $0x50] sm:$0xf] }
  0x16   :  { %v1294_v1 = vld [vmem:[%s1737_s0 + $0xc4] ss:$16 sps:$4 sm:$0xff]   ;;  %v738_v3 = vld [vmem:[%s1739_s3 + $0x48] sm:$0xff]  ;;  %v736_v8 = vld [vmem:[%s1739_s3 + $0x38] sm:$0xff] }
  0x17   :  { %625 = vmatpush1.bf16.msra.mxu1 %v1249_v17  ;;  %169 = vperm.xlu0 %1231, %v116_v46   ;;  %v737_v2 = vld [vmem:[%s1739_s3 + $0x40] sm:$0xff]  ;;  %v1293_v4 = vld [vmem:[%s1737_s0 + $0xa8] ss:$16 sps:$4 sm:$0xff]   ;;  %v1297_v5 = vld [vmem:[%s1737_s0 + $0xcc] ss:$16 sps:$4 sm:$0xff]  }
  0x18   :  { %1109 = vmatpush3.bf16.msra.mxu0 %v1250_v18  ;;  %626 = vmatprep.subr.bf16.mxu1 %v1311_v0  ;;  %v735_v6 = vld [vmem:[%s1739_s3 + $0x30] sm:$0xff]  ;;  %v55_v7 = vld [vmem:[%s1737_s0 + $0xe0] sm:$0xff]  ;;  %v56_v11 = vld [vmem:[%s1737_s0 + $0xe8] sm:$0xff] }
  0x19   :  { %1110 = vmatprep.subr.bf16.mxu0 %v1251_v19  ;;  %154 = vperm.xlu1 %1232, %v113_v47   ;;  %v1296_v9 = vld [vmem:[%s1737_s0 + $0xc0] ss:$16 sps:$4 sm:$0xff]   ;;  %v1048_v10 = vcombine.high %v55_v7, %v55_v7  ;;  %v734_v13 = vld [vmem:[%s1739_s3 + $0x28] sm:$0xff]  ;;  %v1050_v15 = vcombine.high %v56_v11, %v56_v11  ;;  %v732_v17 = vld [vmem:[%s1739_s3 + $0x18] sm:$0xff]  ;;  %v1047_v18 = vcombine.low %v55_v7, %v55_v7 }
  0x1a   :  { %v733_v12 = vld [vmem:[%s1739_s3 + $0x20] sm:$0xff]  ;;  %v1299_v14 = vld [vmem:[%s1737_s0 + $0xc8] ss:$16 sps:$4 sm:$0xff]   ;;  %v731_v16 = vld [vmem:[%s1739_s3 + $0x10] sm:$0xff] }
  0x1b   :  { %627 = vmatpush1.bf16.msra.mxu1 %v1252_v20  ;;  %159 = vperm.xlu0 %1231, %v114_v50   ;;  %v729_v19 = vld [vmem:[%s1739_s3] sm:$0xff]  ;;  %v730_v20 = vld [vmem:[%s1739_s3 + $0x8] sm:$0xff] }
  0x1c   :  { %1111 = vmatpush3.bf16.msra.mxu0 %v1253_v21  ;;  %628 = vmatprep.subr.bf16.mxu1 %v1311_v0  ;;  %v1049_v21 = vcombine.low %v56_v11, %v56_v11  ;;  %v946_v23 = vld [vmem:[%s1740_s5 + $0x8] sm:$0x3] }
  0x1d   :  { %1112 = vmatprep.subr.bf16.mxu0 %v1254_v22  ;;  %144 = vperm.xlu1 %1232, %v111_v51   ;;  %v945_v22 = vld [vmem:[%s1740_s5] sm:$0xff] }
  0x1f   :  { %629 = vmatpush1.bf16.msra.mxu1 %v1255_v24  ;;  %149 = vperm.xlu0 %1231, %v112_v54  }
  0x20   :  { %1113 = vmatpush3.bf16.msra.mxu0 %v1256_v26  ;;  %644 = vmatprep.subr.bf16.mxu1 %v1311_v0  ;;  %v1290_v0 = vld [vmem:[%s1737_s0 + $0xa0] ss:$16 sps:$4 sm:$0xff]  }
  0x21   :  { %134 = vperm.xlu1 %1232, %v109_v55   ;;  %v1304_v26 = vld [vmem:[%s1741_s2] sm:$0xff]  }
  0x23   :  { %551 = vmatmul.mubr.bf16.vlgmr.msra.gmra.mxu0 %v1257_v27  ;;  %645 = vmatpush2.bf16.msra.mxu1 %v1260_v28 }
  0x24   :  { %558 = vmatprep.mubr.bf16.mxu0 %v1264_v29  ;;  %139 = vperm.xlu0 %1231, %v110_v58  }
  0x25   :  { %124 = vperm.xlu1 %1232, %v107_v59  }
  0x26   :  { %647 = vmatmul.mubr.bf16.vlgmr.msra.gmra.mxu1 %v1261_v30 }
  0x27   :  { %1077 = vmatprep.mubr.msk.bf16.mxu1 %vm493_vm0, %v1267_v31 }
  0x28   :  { %129 = vperm.xlu0 %1231, %v108_v62  }
  0x29   :  { %792 = vperm.xlu1 %1232, %v739_v63  }
  0x2b   :  { %559 = vmatmul.mubr.bf16.gmra.mxu0 %v1266_v32 }
  0x2c   :  { %566 = vmatprep.mubr.bf16.mxu0 %v1270_v33  ;;  %782 = vperm.xlu0 %1231, %v737_v2  }
  0x2d   :  { %787 = vperm.xlu1 %1232, %v738_v3  }
  0x2e   :  { %655 = vmatmul.mubr.bf16.gmra.mxu1 %v1269_v34 }
  0x2f   :  { %1078 = vmatprep.mubr.msk.bf16.mxu1 %vm493_vm0, %v1273_v37 }
  0x30   :  { %772 = vperm.xlu0 %1231, %v735_v6  }
  0x31   :  { %777 = vperm.xlu1 %1232, %v736_v8  }
  0x33   :  { %567 = vmatmul.mubr.bf16.gmra.mxu0 %v1272_v40 }
  0x34   :  { %574 = vmatprep.mubr.bf16.mxu0 %v1276_v41  ;;  %762 = vperm.xlu0 %1231, %v733_v12  }
  0x35   :  { %767 = vperm.xlu1 %1232, %v734_v13  }
  0x36   :  { %663 = vmatmul.mubr.bf16.gmra.mxu1 %v1275_v44 }
  0x37   :  { %1079 = vmatprep.mubr.msk.bf16.mxu1 %vm493_vm0, %v1279_v45 }
  0x38   :  { %752 = vperm.xlu0 %1231, %v731_v16  }
  0x39   :  { %757 = vperm.xlu1 %1232, %v732_v17  }
  0x3b   :  { %575 = vmatmul.mubr.bf16.gmra.mxu0 %v1278_v48 }
  0x3c   :  { %582 = vmatprep.mubr.bf16.mxu0 %v1282_v49  ;;  %742 = vperm.xlu0 %1231, %v729_v19  }
  0x3d   :  { %747 = vperm.xlu1 %1232, %v730_v20  }
  0x3e   :  { %671 = vmatmul.mubr.bf16.gmra.mxu1 %v1281_v52 }
  0x3f   :  { %1080 = vmatprep.mubr.msk.bf16.mxu1 %vm493_vm0, %v1285_v53 }
  0x40   :  { %949 = vperm.xlu0 %1231, %v945_v22  }
  0x41   :  { %954 = vperm.xlu1 %1232, %v946_v23  }
  0x43   :  { %583 = vmatmul.mubr.bf16.gmra.mxu0 %v1284_v56 }
  0x44   :  { %590 = vmatprep.mubr.bf16.mxu0 %v1288_v57 }
  0x46   :  { %679 = vmatmul.mubr.bf16.gmra.mxu1 %v1287_v60 }
  0x47   :  { %1081 = vmatprep.mubr.msk.bf16.mxu1 %vm493_vm0, %v1291_v61 }
  0x4b   :  { %591 = vmatmul.mubr.bf16.gmra.mxu0 %v1290_v0 }
  0x4c   :  { %598 = vmatprep.mubr.bf16.mxu0 %v1294_v1 }
  0x4e   :  { %687 = vmatmul.mubr.bf16.gmra.mxu1 %v1293_v4 }
  0x4f   :  { %1082 = vmatprep.mubr.msk.bf16.mxu1 %vm493_vm0, %v1297_v5 }
  0x53   :  { %599 = vmatmul.mubr.bf16.gmra.mxu0 %v1296_v9 }
  0x54   :  { %606 = vmatprep.mubr.bf16.mxu0 %v1048_v10 }
  0x56   :  { %695 = vmatmul.mubr.bf16.gmra.mxu1 %v1299_v14 }
  0x57   :  { %1083 = vmatprep.mubr.msk.bf16.mxu1 %vm493_vm0, %v1050_v15 }
  0x5b   :  { %607 = vmatmul.mubr.bf16.gmra.mxu0 %v1047_v18 }
  0x5c   :  { %1199 = vmatprep.mubr.msk.bf16.mxu0 %vm823_vm1, %v1304_v26 }
  0x5e   :  { %703 = vmatmul.mubr.bf16.gmra.mxu1 %v1049_v21 }
  0x85   :  { %v1622_v24 = vpop.permute.xlu0 %194 }
  0x88   :  { %v1624_v25 = vpop.permute.xlu1 %189 }
  0x8a   :  { %v1629_v27 = vpop.permute.xlu0 %184 }
  0x8c   :  { %v1632_v28 = vpop.permute.xlu1 %174 }
  0x8e   :  { %v1634_v29 = vpop.permute.xlu0 %179 }
  0x90   :  { %v1636_v30 = vpop.permute.xlu1 %164 }
  0x92   :  { %v1638_v31 = vpop.permute.xlu0 %169 }
  0x94   :  { %v1640_v32 = vpop.permute.xlu1 %154 }
  0x96   :  { %v1642_v33 = vpop.permute.xlu0 %159 }
  0x98   :  { %v1644_v34 = vpop.permute.xlu1 %144 }
  0x9a   :  { %v1646_v35 = vpop.permute.xlu0 %149 }
  0x9c   :  { %v135_v36 = vpop.permute.xlu1 %134 }
  0x9f   :  { %v140_v38 = vpop.permute.xlu0 %139 }
  0xa0   :  { %v125_v40 = vpop.permute.xlu1 %124 }
  0xa3   :  { %v130_v47 = vpop.permute.xlu0 %129 }
  0xe3   :  { %v1114_v37 = vpop.f32.mrf.mxu0 }
  0xe5   :  { %v1115_v39 = vpop.f32.mrf.mxu0 }
  0xe6   :  { %v1116_v41 = vadd.f32 %v1115_v39, %v1114_v37  ;;  %v648_v42 = vpop.f32.mrf.mxu1 }
  0xe7   :  { %v1117_v43 = vpop.f32.mrf.mxu0 }
  0xe8   :  { %v553_v44 = vadd.f32 %v1116_v41, %v125_v40  ;;  %v650_v45 = vpop.f32.mrf.mxu1 }
  0xe9   :  { %v1118_v46 = vpop.f32.mrf.mxu0 }
  0xea   :  { %v649_v48 = vadd.f32 %v648_v42, %v553_v44  ;;  %v1119_v49 = vadd.f32 %v1118_v46, %v1117_v43  ;;  %v651_v50 = vpop.f32.mrf.mxu1 }
  0xeb   :  { %v1120_v51 = vpop.f32.mrf.mxu0 }
  0xec   :  { %v556_v52 = vadd.f32 %v1119_v49, %v130_v47  ;;  %v653_v53 = vpop.f32.mrf.mxu1 }
  0xed   :  { %v1121_v54 = vpop.f32.mrf.mxu0 }
  0xee   :  { %v652_v55 = vadd.f32 %v651_v50, %v556_v52  ;;  %v1122_v56 = vadd.f32 %v1121_v54, %v1120_v51  ;;  %v656_v57 = vpop.f32.mrf.mxu1 }
  0xef   :  { %v1123_v58 = vpop.f32.mrf.mxu0 }
  0xf0   :  { %v561_v59 = vadd.f32 %v1122_v56, %v135_v36  ;;  %v658_v60 = vpop.f32.mrf.mxu1  ;;  %v1648_v61 = vpack.c.bf16 %v652_v55, %v649_v48 }
  0xf1   :  { %v1124_v62 = vpop.f32.mrf.mxu0 }
  0xf2   :  { %v657_v63 = vadd.f32 %v656_v57, %v561_v59  ;;  %v1125_v0 = vadd.f32 %v1124_v62, %v1123_v58  ;;  %v659_v1 = vpop.f32.mrf.mxu1 }
  0xf3   :  { %v1650_v2 = vpop.f32.mrf.mxu0 }
  0xf4   :  { %v564_v3 = vadd.f32 %v1125_v0, %v140_v38  ;;  %v661_v4 = vpop.f32.mrf.mxu1 }
  0xf5   :  { %v1652_v5 = vpop.f32.mrf.mxu0 }
  0xf6   :  { %v660_v6 = vadd.f32 %v659_v1, %v564_v3  ;;  %v1654_v7 = vpop.f32.mrf.mxu1 }
  0xf7   :  { %v1656_v8 = vpop.f32.mrf.mxu0 }
  0xf8   :  { %v1658_v9 = vpack.c.bf16 %v660_v6, %v657_v63  ;;  %v666_v10 = vpop.f32.mrf.mxu1 }
  0xf9   :  { %v1660_v11 = vpop.f32.mrf.mxu0 }
  0xfa   :  { %v1662_v12 = vpop.f32.mrf.mxu1 }
  0xfb   :  { %v1664_v13 = vpop.f32.mrf.mxu0 }
  0xfc   :  { %v669_v14 = vpop.f32.mrf.mxu1 }
  0xfd   :  { %v1666_v15 = vpop.f32.mrf.mxu0 }
  0xfe   :  { %v1668_v16 = vpop.f32.mrf.mxu1 }
  0xff   :  { %v1135_v17 = vpop.f32.mrf.mxu0 }
 0x100   :  { %v674_v18 = vpop.f32.mrf.mxu1 }
 0x101   :  { %v1136_v19 = vpop.f32.mrf.mxu0 }
 0x102   :  { %v1670_v20 = vpop.f32.mrf.mxu1 }
 0x103   :  { %v1138_v21 = vpop.f32.mrf.mxu0 }
 0x104   :  { %v677_v22 = vpop.f32.mrf.mxu1 }
 0x105   :  { %v1139_v23 = vpop.f32.mrf.mxu0 }
 0x106   :  { %v1672_v26 = vpop.f32.mrf.mxu1 }
 0x107   :  { %v1141_v36 = vpop.f32.mrf.mxu0 }
 0x108   :  { %v682_v37 = vpop.f32.mrf.mxu1 }
 0x109   :  { %v1142_v38 = vpop.f32.mrf.mxu0 }
 0x10a   :  { %v683_v39 = vpop.f32.mrf.mxu1  ;;  %v1143_v22 = vadd.f32 %v1142_v38, %v1141_v36 }
 0x10b   :  { %v1144_v40 = vpop.f32.mrf.mxu0 }
 0x10c   :  { %v685_v41 = vpop.f32.mrf.mxu1 }
 0x10d   :  { %v1145_v42 = vpop.f32.mrf.mxu0 }
 0x10e   :  { %v688_v43 = vpop.f32.mrf.mxu1  ;;  %v1146_v4 = vadd.f32 %v1145_v42, %v1144_v40  ;;  %v1137_v40 = vadd.f32 %v1136_v19, %v1135_v17 }
 0x10f   :  { %v1147_v44 = vpop.f32.mrf.mxu0 }
 0x110   :  { %v690_v45 = vpop.f32.mrf.mxu1 }
 0x111   :  { %v1148_v46 = vpop.f32.mrf.mxu0 }
 0x112   :  { %v691_v47 = vpop.f32.mrf.mxu1  ;;  %v1149_v62 = vadd.f32 %v1148_v46, %v1147_v44  ;;  %v1140_v44 = vadd.f32 %v1139_v23, %v1138_v21  ;;  %v580_v21 = vadd.f32 %v1137_v40, %v1642_v33 }
 0x113   :  { %v1150_v48 = vpop.f32.mrf.mxu0 }
 0x114   :  { %v693_v49 = vpop.f32.mrf.mxu1  ;;  %v596_v37 = vadd.f32 %v1149_v62, %v1634_v29  ;;  %v1134_v29 = vadd.f32 %v1666_v15, %v1664_v13  ;;  %v585_v36 = vadd.f32 %v1140_v44, %v1636_v30  ;;  %v676_v13 = vadd.f32 %v1670_v20, %v580_v21  ;;  %v793_v20 = vpop.permute.xlu1 %792 }
 0x115   :  { %v1151_v50 = vpop.f32.mrf.mxu0 }
 0x116   :  { %v696_v51 = vpop.f32.mrf.mxu1  ;;  %v1152_v58 = vadd.f32 %v1151_v50, %v1150_v48  ;;  %v692_v42 = vadd.f32 %v691_v47, %v596_v37  ;;  %v577_v23 = vadd.f32 %v1134_v29, %v1640_v32  ;;  %v681_v47 = vadd.f32 %v1672_v26, %v585_v36 }
 0x117   :  { %v1153_v52 = vpop.f32.mrf.mxu0 }
 0x118   :  { %v698_v53 = vpop.f32.mrf.mxu1  ;;  %v601_v6 = vadd.f32 %v1152_v58, %v1629_v27  ;;  %v588_v27 = vadd.f32 %v1143_v22, %v1638_v31  ;;  %v1128_v31 = vadd.f32 %v1652_v5, %v1650_v2  ;;  %v673_v33 = vadd.f32 %v1668_v16, %v577_v23  ;;  %v1307_v5 = vld [vmem:[%s1741_s2 + $0x18] sm:$0xff]  }
 0x119   :  { %v1154_v54 = vpop.f32.mrf.mxu0  ;;  %v788_v53 = vpop.permute.xlu1 %787 }
 0x11a   :  { %v1155_v55 = vadd.f32 %v1154_v54, %v1153_v52  ;;  %v699_v56 = vpop.f32.mrf.mxu1  ;;  %v697_v46 = vadd.f32 %v696_v51, %v601_v6  ;;  %v684_v17 = vadd.f32 %v683_v39, %v588_v27  ;;  %v713_v39 = vpack.c.bf16 %v676_v13, %v673_v33 }
 0x11b   :  { %v1156_v57 = vpop.f32.mrf.mxu0 }
 0x11c   :  { %v701_v59 = vpop.f32.mrf.mxu1  ;;  %v604_v63 = vadd.f32 %v1155_v55, %v1624_v25  ;;  %v593_v25 = vadd.f32 %v1146_v4, %v1632_v28  ;;  %v1131_v28 = vadd.f32 %v1660_v11, %v1656_v8  ;;  %v714_v15 = vpack.c.bf16 %v684_v17, %v681_v47  ;;  %v783_v55 = vpop.permute.xlu0 %782 }
 0x11d   :  { %v1157_v60 = vpop.f32.mrf.mxu0  ;;  %v569_v8 = vadd.f32 %v1128_v31, %v1644_v34  ;;  %v1305_v34 = vld [vmem:[%s1741_s2 + $0x8] sm:$0xff]   ;;  %v778_v58 = vpop.permute.xlu1 %777 }
 0x11e   :  { %v1158_v0 = vadd.f32 %v1157_v60, %v1156_v57  ;;  %v704_v1 = vpop.f32.mrf.mxu1  ;;  %v700_v41 = vadd.f32 %v699_v56, %v604_v63  ;;  %v689_v38 = vadd.f32 %v688_v43, %v593_v25  ;;  %v572_v30 = vadd.f32 %v1131_v28, %v1646_v35  ;;  %v1306_v35 = vld [vmem:[%s1741_s2 + $0x10] sm:$0xff]  }
 0x11f   :  { %v1159_v3 = vpop.f32.mrf.mxu0  ;;  %v665_v32 = vadd.f32 %v1654_v7, %v569_v8  ;;  %v1308_v7 = vld [vmem:[%s1741_s2 + $0x20] sm:$0xff]  }
 0x120   :  { %v609_v10 = vadd.f32 %v1158_v0, %v1622_v24  ;;  %v706_v14 = vpop.f32.mrf.mxu1  ;;  %v716_v24 = vpack.c.bf16 %v700_v41, %v697_v46  ;;  %v715_v19 = vpack.c.bf16 %v692_v42, %v689_v38  ;;  %v668_v11 = vadd.f32 %v1662_v12, %v572_v30  ;;  %v773_v62 = vpop.permute.xlu0 %772  ;;  %v1310_v8 = vld [vmem:[%s1742_s4] sm:$0x1f]  }
 0x121   :  { %v1160_v18 = vpop.f32.mrf.mxu0  ;;  %v768_v6 = vpop.permute.xlu1 %767 }
 0x122   :  { %v705_v45 = vadd.f32 %v704_v1, %v609_v10  ;;  %v707_v48 = vpop.f32.mrf.mxu1  ;;  %v712_v2 = vpack.c.bf16 %v668_v11, %v665_v32 }
 0x124   :  { %v717_v49 = vpack.c.bf16 %v705_v45, %v705_v45  ;;  %v708_v50 = vpop.f32.mrf.mxu1  ;;  %v763_v37 = vpop.permute.xlu0 %762 }
 0x126   :  { %v844_v52 = vsel %vm842_vm2, %v717_v49, 0  ;;  %1227 = vmatprep.subr.msk.bf16.mxu0 %vm842_vm2, %v717_v49  ;;  %v758_v49 = vpop.permute.xlu1 %757 }
 0x127   :  { %1184 = vmatpush3.bf16.msra.mxu0 %v844_v52 }
 0x128   :  { %1185 = vmatprep.subr.bf16.mxu0 %v716_v24  ;;  %v753_v27 = vpop.permute.xlu0 %752 }
 0x12a   :  { %v748_v38 = vpop.permute.xlu1 %747 }
 0x12b   :  { %1186 = vmatpush3.bf16.msra.mxu0 %v716_v24 }
 0x12c   :  { %1187 = vmatprep.subr.bf16.mxu0 %v715_v19 }
 0x12f   :  { %1188 = vmatpush3.bf16.msra.mxu0 %v715_v19  ;;  %v743_v19 = vpop.permute.xlu0 %742 }
 0x130   :  { %1189 = vmatprep.subr.bf16.mxu0 %v714_v15 }
 0x133   :  { %1190 = vmatpush3.bf16.msra.mxu0 %v714_v15  ;;  %v950_v33 = vpop.permute.xlu0 %949 }
 0x134   :  { %1191 = vmatprep.subr.bf16.mxu0 %v713_v39 }
 0x137   :  { %1192 = vmatpush3.bf16.msra.mxu0 %v713_v39 }
 0x138   :  { %1193 = vmatprep.subr.bf16.mxu0 %v712_v2 }
 0x13b   :  { %1194 = vmatpush3.bf16.msra.mxu0 %v712_v2  ;;  %v955_v2 = vpop.permute.xlu1 %954 }
 0x13c   :  { %1195 = vmatprep.subr.bf16.mxu0 %v1658_v9 }
 0x13f   :  { %1196 = vmatpush3.bf16.msra.mxu0 %v1658_v9  ;;  %v1312_v9 = vmov 0.0  }
 0x140   :  { %1197 = vmatprep.subr.bf16.mxu0 %v1648_v61  ;;  %1211 = vmatprep.subr.bf16.mxu1 %v1312_v9 }
 0x141   :  { %1223 = vmatprep.mubr.msk.bf16.mxu1 %vm1313_vm3, %v1312_v9 }
 0x143   :  { %1198 = vmatpush3.bf16.msra.mxu0 %v1648_v61  ;;  %v1309_v61 = vld [vmem:[%s1741_s2 + $0x28] ss:$0 sps:$4 sm:$0x33]  }
 0x146   :  { %1200 = vmatmul.mubr.msk.bf16.vlgmr.msra.gmra.mxu0 %vm823_vm1, %v1305_v34 }
 0x147   :  { %1203 = vmatprep.mubr.msk.bf16.mxu0 %vm823_vm1, %v1306_v35 }
 0x14e   :  { %1204 = vmatmul.mubr.msk.bf16.gmra.mxu0 %vm823_vm1, %v1307_v5 }
 0x14f   :  { %1207 = vmatprep.mubr.msk.bf16.mxu0 %vm823_vm1, %v1308_v7 }
 0x156   :  { %1208 = vmatmul.mubr.msk.bf16.gmra.mxu0 %vm823_vm1, %v1309_v61 }
 0x206   :  { %v1201_v12 = vpop.f32.mrf.mxu0 }
 0x207   :  { %v889_v29 = vadd.f32 %v1201_v12, %v753_v27 }
 0x208   :  { %v880_v16 = vpop.f32.mrf.mxu0 }
 0x209   :  { %v928_v31 = vmax.f32 %v889_v29, 0.0  ;;  %v881_v23 = vadd.f32 %v880_v16, %v743_v19 }
 0x20a   :  { %v1202_v26 = vpop.f32.mrf.mxu0 }
 0x20b   :  { %v892_v42 = vadd.f32 %v1202_v26, %v758_v49  ;;  %v926_v13 = vmax.f32 %v881_v23, 0.0 }
 0x20c   :  { %v883_v43 = vpop.f32.mrf.mxu0 }
 0x20d   :  { %v929_v28 = vmax.f32 %v892_v42, 0.0  ;;  %v884_v21 = vadd.f32 %v883_v43, %v748_v38 }
 0x20e   :  { %v1205_v51 = vpop.f32.mrf.mxu0 }
 0x20f   :  { %v905_v41 = vadd.f32 %v1205_v51, %v773_v62  ;;  %v938_v47 = vpack.c.bf16 %v929_v28, %v928_v31  ;;  %v927_v30 = vmax.f32 %v884_v21, 0.0 }
 0x210   :  { %v896_v54 = vpop.f32.mrf.mxu0 }
 0x211   :  { %v932_v50 = vmax.f32 %v905_v41, 0.0  ;;  %v897_v40 = vadd.f32 %v896_v54, %v763_v37  ;;  %v937_v15 = vpack.c.bf16 %v927_v30, %v926_v13 }
 0x212   :  { %v1206_v56 = vpop.f32.mrf.mxu0 }
 0x213   :  { %v908_v14 = vadd.f32 %v1206_v56, %v778_v58  ;;  %v930_v36 = vmax.f32 %v897_v40, 0.0 }
 0x214   :  { %v899_v57 = vpop.f32.mrf.mxu0 }
 0x215   :  { %v933_v44 = vmax.f32 %v908_v14, 0.0  ;;  %v900_v25 = vadd.f32 %v899_v57, %v768_v6 }
 0x216   :  { %v1209_v59 = vpop.f32.mrf.mxu0 }
 0x217   :  { %v921_v60 = vadd.f32 %v1209_v59, %v793_v20  ;;  %v940_v24 = vpack.c.bf16 %v933_v44, %v932_v50  ;;  %v931_v52 = vmax.f32 %v900_v25, 0.0 }
 0x218   :  { %v912_v63 = vpop.f32.mrf.mxu0 }
 0x219   :  { %v936_v0 = vmax.f32 %v921_v60, 0.0  ;;  %v913_v4 = vadd.f32 %v912_v63, %v783_v55  ;;  %v939_v17 = vpack.c.bf16 %v931_v52, %v930_v36 }
 0x21a   :  { %v1210_v1 = vpop.f32.mrf.mxu0 }
 0x21b   :  { %v942_v3 = vpack.c.bf16 %v936_v0, %v936_v0  ;;  %v934_v45 = vmax.f32 %v913_v4, 0.0 }
 0x21c   :  { %v915_v10 = vpop.f32.mrf.mxu0 }
 0x21d   :  { %v916_v18 = vadd.f32 %v915_v10, %v788_v53  ;;  %v968_v22 = vsel %vm966_vm4, %v942_v3, 0 }
 0x21e   :  { %1212 = vmatpush3.bf16.msra.mxu1 %v968_v22 }
 0x21f   :  { %v935_v48 = vmax.f32 %v916_v18, 0.0  ;;  %1213 = vmatprep.subr.bf16.mxu1 %v1312_v9 }
 0x221   :  { %v941_v46 = vpack.c.bf16 %v935_v48, %v934_v45 }
 0x223   :  { %1214 = vmatpush3.bf16.msra.mxu1 %v941_v46 }
 0x224   :  { %1215 = vmatprep.subr.bf16.mxu1 %v1312_v9 }
 0x227   :  { %1216 = vmatpush3.bf16.msra.mxu1 %v940_v24 }
 0x228   :  { %1217 = vmatprep.subr.bf16.mxu1 %v1312_v9 }
 0x22b   :  { %1218 = vmatpush3.bf16.msra.mxu1 %v939_v17 }
 0x22c   :  { %1219 = vmatprep.subr.bf16.mxu1 %v1312_v9 }
 0x22f   :  { %1220 = vmatpush3.bf16.msra.mxu1 %v938_v47 }
 0x230   :  { %1221 = vmatprep.subr.bf16.mxu1 %v1312_v9 }
 0x233   :  { %1222 = vmatpush3.bf16.msra.mxu1 %v937_v15 }
 0x236   :  { %1224 = vmatmul.mubr.msk.bf16.vlgmr.msra.gmra.mxu1 %vm962_vm5, %v1310_v8 }
 0x2f6   :  { %v1004_v11 = vpop.f32.mrf.mxu1 }
 0x2f7   :  { %v1005_v39 = vadd.f32 %v1004_v11, %v950_v33 }
 0x2f8   :  { %v1225_v32 = vpop.f32.mrf.mxu1 }
 0x2f9   :  { %1012 = vst.msk [vmem:[%s1743_s7] sm:$0xff] %vm1011_vm6, %v1005_v39 }
 0x2fa   :  { %v1007_v34 = vpop.f32.mrf.mxu1 }
 0x2fb   :  { %v1008_v35 = vadd.f32 %v1007_v34, %v955_v2 }
 0x2fc   :  { %v1226_v5 = vpop.f32.mrf.mxu1 }
 0x2fd   :  { %1014 = vst.msk [vmem:[%s1743_s7 + $0x8] sm:$0x3] %vm1013_vm7, %v1008_v35 }

</bundles_post_ra>
